<compile_context>
chip_gen: v7x
topology: tpu7x:2x2x1
jax: 0.10.0
libtpu: 0.0.40
codegen_flags: <defaults>
</compile_context>

<pallas_src>
import functools

import jax
import jax.numpy as jnp
import numpy as np
from jax.experimental import pallas as pl
from jax.experimental.pallas import tpu as pltpu


TYPE_PAD = 128   # lane padding of the answer_type block inside the wide matmul
AUX_W = 8        # lane width of the packed small-output slab (answer_type + score)


# ----------------------------- Pallas kernel ------------------------------ #

def vqa_kernel(
    xi_ref, xq_ref,                 # (TB, Fi), (TB, Fq)  image / question features
    w1i_ref, w1q_ref, b1_ref,       # (Fi, H+128) bf16, (Fq, H+128) bf16, (1, H+128) f32
    whc_ref, bhc_ref,               # (H, 2C+128) bf16, (1, 2C+128) f32
    w2fin_ref,                      # (2, C) f32: row0 = colsum(W2_eff), row1 = b2_eff
    out_ref,                        # (TB, C) f32
    aux_ref,                        # (TB, AUX_W) f32: lanes [0:NT)=answer_type, lane NT=answerability
    *, f_total, hidden, num_classes, num_answer_types, eps=1e-5,
):
  xi = xi_ref[...].astype(jnp.float32)
  xq = xq_ref[...].astype(jnp.float32)

  # --- one LayerNorm-statistics pass over the (split) feature row ---------- #
  inv_f = 1.0 / f_total
  mean = (jnp.sum(xi, axis=-1, keepdims=True)
          + jnp.sum(xq, axis=-1, keepdims=True)) * inv_f
  di = xi - mean
  dq = xq - mean
  var = (jnp.sum(di * di, axis=-1, keepdims=True)
         + jnp.sum(dq * dq, axis=-1, keepdims=True)) * inv_f
  rstd = jax.lax.rsqrt(var + eps)

  # --- F-dim matmul on the *centered* features; rstd applied afterwards ---- #
  #     Lanes [0:H)  -> linear_layer1 (LN1 affine folded in)
  #     Lane  H      -> answerability logit (LN_a affine + both linears folded)
  hw = (jnp.dot(di.astype(jnp.bfloat16), w1i_ref[...],
                preferred_element_type=jnp.float32)
        + jnp.dot(dq.astype(jnp.bfloat16), w1q_ref[...],
                  preferred_element_type=jnp.float32))
  hw = hw * rstd + b1_ref[...]                                 # (TB, H+128) f32
  h = hw[:, :hidden]                                           # (TB, H)
  score = jax.nn.sigmoid(hw[:, hidden:hidden + 1])             # (TB, 1)

  # --- LayerNorm-over-H statistics (affine + matmul fused into whc) -------- #
  inv_h = 1.0 / hidden
  mean_h = jnp.sum(h, axis=-1, keepdims=True) * inv_h
  msq_h = jnp.sum(h * h, axis=-1, keepdims=True) * inv_h
  rstd_h = jax.lax.rsqrt(msq_h - mean_h * mean_h + eps)

  # --- ONE wide (H, C+128+C) matmul from h:
  #     [ answer_mask logits | padded answer_type | h @ W2_eff ] ------------- #
  hc = (jnp.dot(h.astype(jnp.bfloat16), whc_ref[...],
                preferred_element_type=jnp.float32)
        + bhc_ref[...])                                        # (TB, 2C+128) f32
  a_mask = jax.nn.sigmoid(hc[:, :num_classes])                 # (TB, C)
  out_raw = hc[:, num_classes + TYPE_PAD:]                     # (TB, C) ~ h @ W2_eff

  w2fin = w2fin_ref[...]
  w2_colsum = w2fin[0:1, :]                                    # (1, C)
  b2 = w2fin[1:2, :]                                           # (1, C)
  out = (out_raw - mean_h * w2_colsum) * rstd_h + b2           # fused LN2 + Linear_HC
  out_ref[...] = out * a_mask

  # --- pack small outputs into one narrow lane-dense slab ------------------ #
  a_type = hc[:, num_classes:num_classes + AUX_W]              # lanes [0:NT) valid, rest 0
  lane = jax.lax.broadcasted_iota(jnp.int32, a_type.shape, 1)
  aux_ref[...] = jnp.where(lane == num_answer_types, score, a_type)


# --------------------------- Parameter folding ----------------------------- #

def prepare_params(p, f_img):
  """Fold LayerNorm affines / compose linear pairs; build the fused weights."""
  f32, bf16 = jnp.float32, jnp.bfloat16
  F, H = p["w1"].shape
  C = p["w2"].shape[1]
  NT = p["wt"].shape[1]

  # linear_layer1: LN1 affine folded into W1, b1 (Dropout = identity in eval).
  g1, b1ln = p["ln1_g"][0], p["ln1_b"][0]                      # (F,)
  w1_eff = g1[:, None] * p["w1"]                               # (F, H)
  b1_eff = b1ln[None, :] @ p["w1"] + p["b1"]                   # (1, H)

  # answerability: LN_a affine folded, Linear(F,H) o Linear(H,1) composed exactly.
  ga, baln = p["lna_g"][0], p["lna_b"][0]
  wa = p["wa1"] @ p["wa2"]                                     # (F, 1)
  wa_eff = ga[:, None] * wa                                    # (F, 1)
  ba_sc = baln[None, :] @ wa + p["ba1"] @ p["wa2"] + p["ba2"]  # (1, 1)

  # Fuse the answerability column into the F-dim matmul (lane H of a 128-lane pad).
  w1_big = jnp.concatenate(
      [w1_eff, jnp.zeros((F, 128), f32).at[:, :1].set(wa_eff)], axis=1)  # (F, H+128)
  b1_big = jnp.concatenate(
      [b1_eff, jnp.zeros((1, 128), f32).at[:, :1].set(ba_sc)], axis=1)   # (1, H+128)

  # linear_layer2: LN2 affine folded into W2, b2; LN2 normalization fused via
  #   n2 @ W2_eff = rstd_h * (h @ W2_eff - mean_h * colsum(W2_eff)).
  g2, b2ln = p["ln2_g"][0], p["ln2_b"][0]
  w2_eff = g2[:, None] * p["w2"]                               # (H, C)
  b2_eff = b2ln[None, :] @ p["w2"] + p["b2"]                   # (1, C)
  w2_bf = w2_eff.astype(bf16)
  w2_colsum = jnp.sum(w2_bf.astype(f32), axis=0, keepdims=True)  # (1, C)

  # answer_mask path: fold wt@wm so a_mask comes straight from h.
  wt, bt = p["wt"], p["bt"]                                    # (H, NT), (1, NT)
  wm, bm = p["wm"], p["bm"]                                    # (NT, C), (1, C)
  wm_eff = wt @ wm                                             # (H, C)
  bm_eff = bt @ wm + bm                                        # (1, C)
  wt_pad = jnp.zeros((H, TYPE_PAD), f32).at[:, :NT].set(wt)    # lane-aligned answer_type
  bt_pad = jnp.zeros((1, TYPE_PAD), f32).at[:, :NT].set(bt)

  # One wide (H, C + 128 + C) matmul from h: [answer_mask | answer_type | out].
  whc_big = jnp.concatenate([wm_eff, wt_pad, w2_bf.astype(f32)], axis=1)
  bhc_big = jnp.concatenate([bm_eff, bt_pad, jnp.zeros((1, C), f32)], axis=1)

  return dict(
      w1i=w1_big[:f_img].astype(bf16), w1q=w1_big[f_img:].astype(bf16),
      b1=b1_big.astype(f32),
      whc=whc_big.astype(bf16), bhc=bhc_big.astype(f32),
      w2fin=jnp.concatenate([w2_colsum, b2_eff], axis=0).astype(f32),  # (2, C)
  )


# ------------------------------ Wrapper ------------------------------------ #

@functools.partial(jax.jit, static_argnames=("num_answer_types", "tile_b"))
def vqa_forward(image, question, prepped, num_answer_types=4, tile_b=128):
  """Eval-mode VQAModel.forward. Returns (output, answer_type, answerability)."""
  B = image.shape[0]
  # No wrapper-side astype (that would be an extra un-fused HBM pass) -- the
  # kernel upcasts for the LayerNorm statistics internally.
  xi = image.reshape(B, -1)
  xq = question.reshape(B, -1)
  Fi, Fq = xi.shape[1], xq.shape[1]
  F = Fi + Fq
  H = prepped["whc"].shape[0]
  C = prepped["w2fin"].shape[1]
  assert prepped["w1i"].shape == (Fi, H + 128)
  assert prepped["w1q"].shape == (Fq, H + 128)
  assert num_answer_types + 1 <= AUX_W

  tb = min(tile_b, B)
  assert B % tb == 0 and tb % 8 == 0, "batch tile must divide B and be a multiple of 8"
  grid = (B // tb,)

  full = lambda shape: pl.BlockSpec(shape, lambda i: (0,) * len(shape))
  row = lambda last: pl.BlockSpec((tb, last), lambda i: (i, 0))

  kernel = functools.partial(
      vqa_kernel, f_total=F, hidden=H, num_classes=C,
      num_answer_types=num_answer_types)

  out, aux = pl.pallas_call(
      kernel,
      grid=grid,
      in_specs=[
          row(Fi), row(Fq),                                   # image / question features
          full((Fi, H + 128)), full((Fq, H + 128)), full((1, H + 128)),
          full((H, 2 * C + TYPE_PAD)), full((1, 2 * C + TYPE_PAD)),
          full((2, C)),
      ],
      out_specs=[row(C), row(AUX_W)],
      out_shape=[
          jax.ShapeDtypeStruct((B, C), jnp.float32),
          jax.ShapeDtypeStruct((B, AUX_W), jnp.float32),
      ],
      compiler_params=pltpu.CompilerParams(
          dimension_semantics=("parallel",)),
  )(xi, xq,
    prepped["w1i"], prepped["w1q"], prepped["b1"],
    prepped["whc"], prepped["bhc"], prepped["w2fin"])

  answer_type = aux[:, :num_answer_types]
  answerability = aux[:, num_answer_types]
  return out, answer_type, answerability


# --------------------- Pure-JAX reference (unfolded) ----------------------- #

def vqa_forward_ref(image, question, params):
  B = image.shape[0]
  x = jnp.concatenate(
      [image.reshape(B, -1), question.reshape(B, -1)], axis=1).astype(jnp.float32)

  def ln(v, g, b, eps=1e-5):
    m = jnp.mean(v, axis=-1, keepdims=True)
    var = jnp.mean((v - m) ** 2, axis=-1, keepdims=True)
    return (v - m) / jnp.sqrt(var + eps) * g + b

  xa = ln(x, params["lna_g"], params["lna_b"])
  ha = xa @ params["wa1"] + params["ba1"]
  score = jax.nn.sigmoid(ha @ params["wa2"] + params["ba2"]).squeeze(-1)

  h = ln(x, params["ln1_g"], params["ln1_b"]) @ params["w1"] + params["b1"]
  a_type = h @ params["wt"] + params["bt"]
  a_mask = jax.nn.sigmoid(a_type @ params["wm"] + params["bm"])
  out = (ln(h, params["ln2_g"], params["ln2_b"]) @ params["w2"] + params["b2"]) * a_mask
  return out, a_type, score


# -------------------------- Parameter construction ------------------------- #

def make_params(key, feat_dim, hidden, num_classes):
  """Deterministic init matching PyTorch Linear / LayerNorm defaults."""
  ks = jax.random.split(key, 12)

  def linear(kw, kb, fan_in, fan_out):
    bound = 1.0 / np.sqrt(fan_in)
    w = jax.random.uniform(kw, (fan_in, fan_out), jnp.float32, -bound, bound)
    b = jax.random.uniform(kb, (1, fan_out), jnp.float32, -bound, bound)
    return w, b

  p = {}
  p["ln1_g"] = jnp.ones((1, feat_dim), jnp.float32)
  p["ln1_b"] = jnp.zeros((1, feat_dim), jnp.float32)
  p["w1"], p["b1"] = linear(ks[0], ks[1], feat_dim, hidden)
  p["ln2_g"] = jnp.ones((1, hidden), jnp.float32)
  p["ln2_b"] = jnp.zeros((1, hidden), jnp.float32)
  p["w2"], p["b2"] = linear(ks[2], ks[3], hidden, num_classes)
  p["wt"], p["bt"] = linear(ks[4], ks[5], hidden, 4)
  p["wm"], p["bm"] = linear(ks[6], ks[7], 4, num_classes)
  p["lna_g"] = jnp.ones((1, feat_dim), jnp.float32)
  p["lna_b"] = jnp.zeros((1, feat_dim), jnp.float32)
  p["wa1"], p["ba1"] = linear(ks[8], ks[9], feat_dim, hidden)
  p["wa2"], p["ba2"] = linear(ks[10], ks[11], feat_dim and hidden, 1)
  return p


if __name__ == "__main__":
  # Synthetic shapes consistent with the forward pass:
  #   image features (B, 16, 16) -> flatten -> 256; text features (B, 256)
  #   concat feature dim F = 512, hidden = 128, num_classes = 128
  # B = 256 with tile_b = 128 gives a 2-step "parallel" grid (v7x's 2 TCs).
  B, H_IMG, W_IMG, TXT = 256, 16, 16, 256
  HIDDEN, NUM_CLASSES = 128, 128
  FEAT = H_IMG * W_IMG + TXT

  key = jax.random.PRNGKey(0)
  k_img, k_txt, k_par = jax.random.split(key, 3)
  image = jax.random.normal(k_img, (B, H_IMG, W_IMG), jnp.float32)
  question = jax.random.normal(k_txt, (B, TXT), jnp.float32)
  params = make_params(k_par, FEAT, HIDDEN, NUM_CLASSES)

  prepped = prepare_params(params, f_img=H_IMG * W_IMG)
  num_types = params["wt"].shape[1]

  out, a_type, answerability = vqa_forward(
      image, question, prepped, num_answer_types=num_types, tile_b=128)
  jax.block_until_ready((out, a_type, answerability))

  ref_out, ref_type, ref_ans = vqa_forward_ref(image, question, params)
  # bf16 MXU matmuls (on centered-but-unscaled inputs) -> relaxed tolerance.
  np.testing.assert_allclose(np.asarray(out), np.asarray(ref_out), atol=3e-2, rtol=3e-2)
  np.testing.assert_allclose(np.asarray(a_type), np.asarray(ref_type), atol=3e-2, rtol=3e-2)
  np.testing.assert_allclose(np.asarray(answerability), np.asarray(ref_ans), atol=3e-2, rtol=3e-2)

  print("KERNEL_OK")
</pallas_src>

<mosaic_0001>
module attributes {stable_mosaic.version = 11 : i64} {
  func.func @vqa_kernel(%arg0: i32, %arg1: memref<128x256xf32, #tpu.memory_space<vmem>>, %arg2: memref<128x256xf32, #tpu.memory_space<vmem>>, %arg3: memref<256x256xbf16, #tpu.memory_space<vmem>>, %arg4: memref<256x256xbf16, #tpu.memory_space<vmem>>, %arg5: memref<1x256xf32, #tpu.memory_space<vmem>>, %arg6: memref<128x384xbf16, #tpu.memory_space<vmem>>, %arg7: memref<1x384xf32, #tpu.memory_space<vmem>>, %arg8: memref<2x128xf32, #tpu.memory_space<vmem>>, %arg9: memref<128x128xf32, #tpu.memory_space<vmem>>, %arg10: memref<128x8xf32, #tpu.memory_space<vmem>>) attributes {dimension_semantics = [#tpu.dimension_semantics<parallel>], iteration_bounds = array<i64: 2>, scalar_prefetch = 0 : i64, scratch_operands = 0 : i64, tpu.core_type = #tpu.core_type<tc>, window_params = [{transform_indices = @transform_0, window_bounds = array<i64: 128, 256>}, {transform_indices = @transform_1, window_bounds = array<i64: 128, 256>}, {pipeline_mode = #tpu.pipeline_mode<synchronous>, transform_indices = @transform_2, window_bounds = array<i64: 256, 256>}, {pipeline_mode = #tpu.pipeline_mode<synchronous>, transform_indices = @transform_3, window_bounds = array<i64: 256, 256>}, {pipeline_mode = #tpu.pipeline_mode<synchronous>, transform_indices = @transform_4, window_bounds = array<i64: 1, 256>}, {pipeline_mode = #tpu.pipeline_mode<synchronous>, transform_indices = @transform_5, window_bounds = array<i64: 128, 384>}, {pipeline_mode = #tpu.pipeline_mode<synchronous>, transform_indices = @transform_6, window_bounds = array<i64: 1, 384>}, {pipeline_mode = #tpu.pipeline_mode<synchronous>, transform_indices = @transform_7, window_bounds = array<i64: 2, 128>}, {transform_indices = @transform_8, window_bounds = array<i64: 128, 128>}, {transform_indices = @transform_9, window_bounds = array<i64: 128, 8>}]} {
    %c0 = arith.constant 0 : index
    %c0_0 = arith.constant 0 : index
    %0 = vector.load %arg1[%c0, %c0_0] : memref<128x256xf32, #tpu.memory_space<vmem>>, vector<128x256xf32>
    %c0_1 = arith.constant 0 : index
    %c0_2 = arith.constant 0 : index
    %1 = vector.load %arg2[%c0_1, %c0_2] : memref<128x256xf32, #tpu.memory_space<vmem>>, vector<128x256xf32>
    %cst = arith.constant dense<0.000000e+00> : vector<128xf32>
    %2 = vector.multi_reduction <add>, %0, %cst [1] : vector<128x256xf32> to vector<128xf32>
    %3 = vector.shape_cast %2 : vector<128xf32> to vector<128x1xf32>
    %cst_3 = arith.constant dense<0.000000e+00> : vector<128xf32>
    %4 = vector.multi_reduction <add>, %1, %cst_3 [1] : vector<128x256xf32> to vector<128xf32>
    %5 = vector.shape_cast %4 : vector<128xf32> to vector<128x1xf32>
    %6 = arith.addf %3, %5 : vector<128x1xf32>
    %cst_4 = arith.constant 0.001953125 : f32
    %7 = vector.broadcast %cst_4 : f32 to vector<128x1xf32>
    %8 = arith.mulf %6, %7 : vector<128x1xf32>
    %9 = vector.broadcast %8 : vector<128x1xf32> to vector<128x256xf32>
    %10 = arith.subf %0, %9 : vector<128x256xf32>
    %11 = vector.broadcast %8 : vector<128x1xf32> to vector<128x256xf32>
    %12 = arith.subf %1, %11 : vector<128x256xf32>
    %13 = arith.mulf %10, %10 : vector<128x256xf32>
    %cst_5 = arith.constant dense<0.000000e+00> : vector<128xf32>
    %14 = vector.multi_reduction <add>, %13, %cst_5 [1] : vector<128x256xf32> to vector<128xf32>
    %15 = vector.shape_cast %14 : vector<128xf32> to vector<128x1xf32>
    %16 = arith.mulf %12, %12 : vector<128x256xf32>
    %cst_6 = arith.constant dense<0.000000e+00> : vector<128xf32>
    %17 = vector.multi_reduction <add>, %16, %cst_6 [1] : vector<128x256xf32> to vector<128xf32>
    %18 = vector.shape_cast %17 : vector<128xf32> to vector<128x1xf32>
    %19 = arith.addf %15, %18 : vector<128x1xf32>
    %cst_7 = arith.constant 0.001953125 : f32
    %20 = vector.broadcast %cst_7 : f32 to vector<128x1xf32>
    %21 = arith.mulf %19, %20 : vector<128x1xf32>
    %cst_8 = arith.constant 9.99999974E-6 : f32
    %22 = vector.broadcast %cst_8 : f32 to vector<128x1xf32>
    %23 = arith.addf %21, %22 : vector<128x1xf32>
    %24 = math.rsqrt %23 : vector<128x1xf32>
    %25 = arith.truncf %10 : vector<128x256xf32> to vector<128x256xbf16>
    %c0_9 = arith.constant 0 : index
    %c0_10 = arith.constant 0 : index
    %26 = vector.load %arg3[%c0_9, %c0_10] : memref<256x256xbf16, #tpu.memory_space<vmem>>, vector<256x256xbf16>
    %cst_11 = arith.constant dense<0.000000e+00> : vector<128x256xf32>
    %27 = tpu.matmul %25, %26, %cst_11 {dimension_numbers = #tpu.dot_dimension_numbers<[1], [0], [0], [1], [0, 0, 1, 1], [], []>} : vector<128x256xbf16>, vector<256x256xbf16>, vector<128x256xf32> -> vector<128x256xf32>
    %28 = arith.truncf %12 : vector<128x256xf32> to vector<128x256xbf16>
    %c0_12 = arith.constant 0 : index
    %c0_13 = arith.constant 0 : index
    %29 = vector.load %arg4[%c0_12, %c0_13] : memref<256x256xbf16, #tpu.memory_space<vmem>>, vector<256x256xbf16>
    %cst_14 = arith.constant dense<0.000000e+00> : vector<128x256xf32>
    %30 = tpu.matmul %28, %29, %cst_14 {dimension_numbers = #tpu.dot_dimension_numbers<[1], [0], [0], [1], [0, 0, 1, 1], [], []>} : vector<128x256xbf16>, vector<256x256xbf16>, vector<128x256xf32> -> vector<128x256xf32>
    %31 = arith.addf %27, %30 : vector<128x256xf32>
    %32 = vector.broadcast %24 : vector<128x1xf32> to vector<128x256xf32>
    %33 = arith.mulf %31, %32 : vector<128x256xf32>
    %c0_15 = arith.constant 0 : index
    %c0_16 = arith.constant 0 : index
    %34 = vector.load %arg5[%c0_15, %c0_16] : memref<1x256xf32, #tpu.memory_space<vmem>>, vector<1x256xf32>
    %35 = vector.broadcast %34 : vector<1x256xf32> to vector<128x256xf32>
    %36 = arith.addf %33, %35 : vector<128x256xf32>
    %37 = vector.extract_strided_slice %36 {offsets = [0, 0], sizes = [128, 128], strides = [1, 1]} : vector<128x256xf32> to vector<128x128xf32>
    %38 = vector.extract_strided_slice %36 {offsets = [0, 128], sizes = [128, 1], strides = [1, 1]} : vector<128x256xf32> to vector<128x1xf32>
    %39 = arith.negf %38 : vector<128x1xf32>
    %40 = math.exp %39 : vector<128x1xf32>
    %cst_17 = arith.constant 1.000000e+00 : f32
    %41 = vector.broadcast %cst_17 : f32 to vector<128x1xf32>
    %42 = arith.addf %41, %40 : vector<128x1xf32>
    %43 = arith.divf %41, %42 : vector<128x1xf32>
    %cst_18 = arith.constant dense<0.000000e+00> : vector<128xf32>
    %44 = vector.multi_reduction <add>, %37, %cst_18 [1] : vector<128x128xf32> to vector<128xf32>
    %45 = vector.shape_cast %44 : vector<128xf32> to vector<128x1xf32>
    %cst_19 = arith.constant 7.812500e-03 : f32
    %46 = vector.broadcast %cst_19 : f32 to vector<128x1xf32>
    %47 = arith.mulf %45, %46 : vector<128x1xf32>
    %48 = arith.mulf %37, %37 : vector<128x128xf32>
    %cst_20 = arith.constant dense<0.000000e+00> : vector<128xf32>
    %49 = vector.multi_reduction <add>, %48, %cst_20 [1] : vector<128x128xf32> to vector<128xf32>
    %50 = vector.shape_cast %49 : vector<128xf32> to vector<128x1xf32>
    %cst_21 = arith.constant 7.812500e-03 : f32
    %51 = vector.broadcast %cst_21 : f32 to vector<128x1xf32>
    %52 = arith.mulf %50, %51 : vector<128x1xf32>
    %53 = arith.mulf %47, %47 : vector<128x1xf32>
    %54 = arith.subf %52, %53 : vector<128x1xf32>
    %cst_22 = arith.constant 9.99999974E-6 : f32
    %55 = vector.broadcast %cst_22 : f32 to vector<128x1xf32>
    %56 = arith.addf %54, %55 : vector<128x1xf32>
    %57 = math.rsqrt %56 : vector<128x1xf32>
    %58 = arith.truncf %37 : vector<128x128xf32> to vector<128x128xbf16>
    %c0_23 = arith.constant 0 : index
    %c0_24 = arith.constant 0 : index
    %59 = vector.load %arg6[%c0_23, %c0_24] : memref<128x384xbf16, #tpu.memory_space<vmem>>, vector<128x384xbf16>
    %cst_25 = arith.constant dense<0.000000e+00> : vector<128x384xf32>
    %60 = tpu.matmul %58, %59, %cst_25 {dimension_numbers = #tpu.dot_dimension_numbers<[1], [0], [0], [1], [0, 0, 1, 1], [], []>} : vector<128x128xbf16>, vector<128x384xbf16>, vector<128x384xf32> -> vector<128x384xf32>
    %c0_26 = arith.constant 0 : index
    %c0_27 = arith.constant 0 : index
    %61 = vector.load %arg7[%c0_26, %c0_27] : memref<1x384xf32, #tpu.memory_space<vmem>>, vector<1x384xf32>
    %62 = vector.broadcast %61 : vector<1x384xf32> to vector<128x384xf32>
    %63 = arith.addf %60, %62 : vector<128x384xf32>
    %64 = vector.extract_strided_slice %63 {offsets = [0, 0], sizes = [128, 128], strides = [1, 1]} : vector<128x384xf32> to vector<128x128xf32>
    %65 = arith.negf %64 : vector<128x128xf32>
    %66 = math.exp %65 : vector<128x128xf32>
    %cst_28 = arith.constant 1.000000e+00 : f32
    %67 = vector.broadcast %cst_28 : f32 to vector<128x128xf32>
    %68 = arith.addf %67, %66 : vector<128x128xf32>
    %69 = arith.divf %67, %68 : vector<128x128xf32>
    %70 = vector.extract_strided_slice %63 {offsets = [0, 256], sizes = [128, 128], strides = [1, 1]} : vector<128x384xf32> to vector<128x128xf32>
    %c0_29 = arith.constant 0 : index
    %c0_30 = arith.constant 0 : index
    %71 = vector.load %arg8[%c0_29, %c0_30] : memref<2x128xf32, #tpu.memory_space<vmem>>, vector<2x128xf32>
    %72 = vector.extract_strided_slice %71 {offsets = [0, 0], sizes = [1, 128], strides = [1, 1]} : vector<2x128xf32> to vector<1x128xf32>
    %73 = vector.extract_strided_slice %71 {offsets = [1, 0], sizes = [1, 128], strides = [1, 1]} : vector<2x128xf32> to vector<1x128xf32>
    %74 = vector.broadcast %47 : vector<128x1xf32> to vector<128x128xf32>
    %75 = vector.broadcast %72 : vector<1x128xf32> to vector<128x128xf32>
    %76 = arith.mulf %74, %75 : vector<128x128xf32>
    %77 = arith.subf %70, %76 : vector<128x128xf32>
    %78 = vector.broadcast %57 : vector<128x1xf32> to vector<128x128xf32>
    %79 = arith.mulf %77, %78 : vector<128x128xf32>
    %80 = vector.broadcast %73 : vector<1x128xf32> to vector<128x128xf32>
    %81 = arith.addf %79, %80 : vector<128x128xf32>
    %82 = arith.mulf %81, %69 : vector<128x128xf32>
    %c0_31 = arith.constant 0 : index
    %c0_32 = arith.constant 0 : index
    %83 = vector.load %arg9[%c0_31, %c0_32] : memref<128x128xf32, #tpu.memory_space<vmem>>, vector<128x128xf32>
    tpu.vector_store %arg9[%c0_31, %c0_32], %82 {strides = array<i32>} : memref<128x128xf32, #tpu.memory_space<vmem>>, vector<128x128xf32>,
    %84 = vector.extract_strided_slice %63 {offsets = [0, 128], sizes = [128, 8], strides = [1, 1]} : vector<128x384xf32> to vector<128x8xf32>
    %85 = tpu.iota {dimensions = array<i32: 1>} : vector<128x8xi32>
    %c4_i32 = arith.constant 4 : i32
    %86 = vector.broadcast %c4_i32 : i32 to vector<128x8xi32>
    %87 = arith.cmpi eq, %85, %86 : vector<128x8xi32>
    %88 = vector.shape_cast %43 : vector<128x1xf32> to vector<128x1xf32>
    %89 = vector.broadcast %88 : vector<128x1xf32> to vector<128x8xf32>
    %90 = arith.select %87, %89, %84 : vector<128x8xi1>, vector<128x8xf32>
    %c0_33 = arith.constant 0 : index
    %c0_34 = arith.constant 0 : index
    %91 = vector.load %arg10[%c0_33, %c0_34] : memref<128x8xf32, #tpu.memory_space<vmem>>, vector<128x8xf32>
    tpu.vector_store %arg10[%c0_33, %c0_34], %90 {strides = array<i32>} : memref<128x8xf32, #tpu.memory_space<vmem>>, vector<128x8xf32>,
    return
  }
  func.func @transform_0(%arg0: i32) -> (i32, i32) {
    %c0_i32 = arith.constant 0 : i32
    %c0_i32_0 = arith.constant 0 : i32
    return %arg0, %c0_i32 : i32, i32
  }
  func.func @transform_1(%arg0: i32) -> (i32, i32) {
    %c0_i32 = arith.constant 0 : i32
    %c0_i32_0 = arith.constant 0 : i32
    return %arg0, %c0_i32 : i32, i32
  }
  func.func @transform_2(%arg0: i32) -> (i32, i32) {
    %c0_i32 = arith.constant 0 : i32
    %c0_i32_0 = arith.constant 0 : i32
    %c0_i32_1 = arith.constant 0 : i32
    return %c0_i32, %c0_i32_0 : i32, i32
  }
  func.func @transform_3(%arg0: i32) -> (i32, i32) {
    %c0_i32 = arith.constant 0 : i32
    %c0_i32_0 = arith.constant 0 : i32
    %c0_i32_1 = arith.constant 0 : i32
    return %c0_i32, %c0_i32_0 : i32, i32
  }
  func.func @transform_4(%arg0: i32) -> (i32, i32) {
    %c0_i32 = arith.constant 0 : i32
    %c0_i32_0 = arith.constant 0 : i32
    %c0_i32_1 = arith.constant 0 : i32
    return %c0_i32, %c0_i32_0 : i32, i32
  }
  func.func @transform_5(%arg0: i32) -> (i32, i32) {
    %c0_i32 = arith.constant 0 : i32
    %c0_i32_0 = arith.constant 0 : i32
    %c0_i32_1 = arith.constant 0 : i32
    return %c0_i32, %c0_i32_0 : i32, i32
  }
  func.func @transform_6(%arg0: i32) -> (i32, i32) {
    %c0_i32 = arith.constant 0 : i32
    %c0_i32_0 = arith.constant 0 : i32
    %c0_i32_1 = arith.constant 0 : i32
    return %c0_i32, %c0_i32_0 : i32, i32
  }
  func.func @transform_7(%arg0: i32) -> (i32, i32) {
    %c0_i32 = arith.constant 0 : i32
    %c0_i32_0 = arith.constant 0 : i32
    %c0_i32_1 = arith.constant 0 : i32
    return %c0_i32, %c0_i32_0 : i32, i32
  }
  func.func @transform_8(%arg0: i32) -> (i32, i32) {
    %c0_i32 = arith.constant 0 : i32
    %c0_i32_0 = arith.constant 0 : i32
    return %arg0, %c0_i32 : i32, i32
  }
  func.func @transform_9(%arg0: i32) -> (i32, i32) {
    %c0_i32 = arith.constant 0 : i32
    %c0_i32_0 = arith.constant 0 : i32
    return %arg0, %c0_i32 : i32, i32
  }
}

</mosaic_0001>

<bundles_post_ra>
// kernel: vqa_forward.1
= control target key start
LH: loop header
LB: loop body
LE: loop exit
PB: predicated region body
PF: predicated region fallthrough
CT: control target
= control target key end

     0   :  { %15 = vsyncpa [#allocation3], 0  ;;  %s4951_s0 = inlined_call_operand.vmem [shape: f32[256,256], index: 0, kind: input, shape index: {}]   ;;  %s4952_s1 = inlined_call_operand.vmem [shape: f32[256,256], index: 1, kind: input, shape index: {}]   ;;  %s4953_s2 = inlined_call_operand.vmem [shape: bf16[256,256], index: 2, kind: input, shape index: {}]   ;;  %s4954_s3 = inlined_call_operand.vmem [shape: bf16[256,256], index: 3, kind: input, shape index: {}]   ;;  %s4955_s4 = inlined_call_operand.vmem [shape: f32[1,256], index: 4, kind: input, shape index: {}]   ;;  %s4956_s5 = inlined_call_operand.hbm [shape: bf16[128,384], index: 5, kind: input, shape index: {}]   ;;  %s4957_s6 = inlined_call_operand.vmem [shape: f32[1,384], index: 6, kind: input, shape index: {}]   ;;  %s4958_s7 = inlined_call_operand.vmem [shape: f32[2,128], index: 7, kind: input, shape index: {}]   ;;  %s4959_s8 = inlined_call_operand.hbm [shape: f32[256,128], index: 8, kind: output, shape index: {0}]   ;;  %s4960_s9 = inlined_call_operand.vmem [shape: f32[256,8], index: 9, kind: output, shape index: {1}]  }
   0x1   :  { %16 = vsyncpa [#allocation4], 0 }
   0x2   :  { %18 = vsyncpa [#allocation4 + $0x1], 0  ;;  %s3461_s30 = smov 0   ;;  %s3463_s10 = smov 0  }
   0x3   :  { %s3465_s11 = smov 0   ;;  %s3467_s12 = smov 0  }
   0x4 LB: > { %s3482_s13 = sadd.s32 4294967295, %s3402_s12   ;;  %s2708_s14 = sadd.s32 4294967294, %s3402_s12   ;;  %s3402_s12 = sphi %s3467_s12, %s5059_s12   ;;  %s3398_s11 = sphi %s3465_s11, %s5058_s11   ;;  %s3394_s10 = sphi %s3463_s10, %s5057_s10   ;;  %s3390_s30 = sphi %s3461_s30, %s5056_s30  }
   0x5   : > { %s3486_s15 = sadd.s32 1, %s3402_s12   ;;  %s209_s16 = sadd.s32 1, %s3398_s11 }
   0x6   : > { %s206_s17 = ssub.s32 %s3402_s12, %s3486_s15  ;;  %p219_p0 = scmp.ne.s32.totalorder %s3398_s11, %s3394_s10 }
   0x7   : > { %p207_p1 = scmp.eq.s32.totalorder %s206_s17, 0  ;;  %p220_p2 = scmp.eq.s32.totalorder %s3482_s13, 1 }
   0x8   : > { %p225_p3 = scmp.ne.s32.totalorder %s3394_s10, %s3390_s30  ;;  %p226_p4 = scmp.eq.s32.totalorder %s2708_s14, 1 }
   0x9   : > { %s3497_s18 = scalar_select %p207_p1, %s3398_s11, %s209_s16  }
   0xa   : > { %p3499_p5 = por %p220_p2, %p219_p0  ;;  %p3503_p6 = por %p226_p4, %p225_p3 }
   0xb   : > { %p2709_p7 = scmp.ge.s32.totalorder %s3402_s12, 1  ;;  %p259_p8 = scmp.lt.s32.totalorder %s3402_s12, 3 }
   0xc   : > { %s4986_s19 = scalar_select %p3499_p5, 1, 0 }
   0xd   : > { %s4987_s20 = scalar_select %p3503_p6, 1, 0 }
   0xe   : > { %p4961_p9 = scmp.eq.s32.totalorder %s3482_s13, 0  ;;  %p3510_p10 = pnand %p2709_p7, %p259_p8 }
   0xf   : > { %s3404_s22 = smov [#allocation2]   ;;  %s3308_s27 = scalar_lea.hbm %s4956_s5, 3072 }
  0x10   : > { %s4988_s21 = scalar_select %p3510_p10, 1, 0 }
  0x11   : > { %s280_s23 = sshll.u32 %s3404_s22, 4  ;;  %p2937_p11 = pneg %p3510_p10  ;;  %s281_s23 = int_to_ptr.vmem [resolvable:$true] %s280_s23 }
  0x12   : > { %p3309_p13 = scmp.ne.s32.totalorder %s4956_s5, %s3308_s27  ;;  %p3315_p3 = scmp.lt.u32.totalorder %s3308_s27, %s4956_s5 }
  0x13   : > { %p3518_p12 = pnand %p4961_p9, %p2937_p11 }
  0x15   : > { %p3310_p0 = pneg %p3518_p12 }
  0x17   : > { %p3311_p1 = pnand %p3310_p0, %p3309_p13 }
  0x19   : > { %p3312_p2 = pneg %p3311_p1 }
  0x1b   : > { %p3317_p4 = pnand %p3315_p3, %p3312_p2 }
  0x1d   : > { %3320 = shalt.err (!%p3317_p4)
}
  0x1e   : > { %s3321_s17 = scalar_lea.vmem %s281_s23, 3072  ;;  %p3329_p9 = scmp.lt.s32.totalorder %s281_s23, %s281_s23 }
  0x1f   : > { %p3322_p7 = scmp.ne.s32.totalorder %s281_s23, %s3321_s17  ;;  %p3330_p6 = scmp.lt.s32.totalorder %s3321_s17, %s3321_s17 }
  0x21   : > { %p3324_p8 = pnand %p3322_p7, %p3310_p0  ;;  %p3331_p5 = por %p3330_p6, %p3329_p9 }
  0x23   : > { %p3325_p11 = pneg %p3324_p8 }
  0x25   : > { %p3332_p10 = pnand %p3331_p5, %p3325_p11 }
  0x27   : > { %3335 = shalt.err (!%p3332_p10)
}
  0x28   : > { %s3405_s22 = smov 192   ;;  %s3406_s25 = smov 12  }
  0x29   : > { %2940 = dma.hbm_to_vmem [thread:$0]  (!%p3518_p12), %s4956_s5, 3072, %s281_s23, [#allocation3], %s3405_s22, %s3405_s22, %s3406_s25  }
  0x2a   : > { %p4990_p13 = scmp.ne.s32.totalorder %s4988_s21, 0 }
  0x2c   : > { %322 = sbr.rel (%p4990_p13) target bundleno = 1133 (0x46d), region = 52 }
  0x33   : > { %p4991_p1 = scmp.eq.s32.totalorder %s3482_s13, 0 }
  0x35   : > { %3381 = dma.done.wait (%p4991_p1), [#allocation3], 3072   ;;  %p4992_p0 = pmov %p4991_p1 }
  0x36   : > { %s2715_s27 = sshll.u32 %s3482_s13, 4  ;;  %v2988_v42 = vld [vmem:[%s4954_s3 + $0x4] ss:$8 sps:$4 sm:$0xff]   ;;  %v2990_v43 = vld [vmem:[%s4954_s3] ss:$8 sps:$4 sm:$0xff]   ;;  %vm2557_vm1 = vcmask 64512  }
  0x37   : > { %3383 = vsyncadd (%p4992_p0), [#allocation3], 4294964224  ;;  %p371_p5 = scmp.lt.s32.totalorder %s2715_s27, 31  ;;  %v2991_v46 = vld [vmem:[%s4954_s3 + $0x14] ss:$8 sps:$4 sm:$0xff]   ;;  %1128 = vmatprep.subr.bf16.mxu0 %v2988_v42  ;;  %p5054_p9 = scmp.ne.s32.totalorder %s4986_s19, 0 }
  0x38   : > { %1129 = vmatpush1.bf16.msra.mxu0 %v2990_v43  ;;  %v2993_v49 = vld [vmem:[%s4954_s3 + $0x10] ss:$8 sps:$4 sm:$0xff]   ;;  %v2994_v51 = vld [vmem:[%s4954_s3 + $0x24] ss:$8 sps:$4 sm:$0xff]   ;;  %v2996_v57 = vld [vmem:[%s4954_s3 + $0x20] ss:$8 sps:$4 sm:$0xff]  }
  0x39   : > { %s5061_s27 = smov (!%p371_p5, %s2715_s27), 31  ;;  %1130 = vmatprep.subr.bf16.mxu0 %v2991_v46  ;;  %v2997_v59 = vld [vmem:[%s4954_s3 + $0x34] ss:$8 sps:$4 sm:$0xff]  }
  0x3a   : > { %s2848_s24 = sshll.u32 %s5061_s27, 4 }
  0x3b   : > { %s3551_s23 = scalar_lea.vmem %s4952_s1, %s2848_s24  ;;  %s3556_s17 = scalar_lea.vmem %s4951_s0, %s2848_s24 }
  0x3c   : > { %v3559_v0 = vld [vmem:[%s3551_s23] sm:$0xff]  ;;  %v3562_v1 = vld [vmem:[%s3551_s23 + $0x8] sm:$0xff]  ;;  %v3573_v5 = vld [vmem:[%s3551_s23 + $0x10] sm:$0xff]  ;;  %1131 = vmatpush1.bf16.msra.mxu0 %v2993_v49  ;;  %s2850_s24 = sshll.u32 %s3482_s13, 11 }
  0x3d   : > { %v3565_v2 = vld [vmem:[%s3556_s17] sm:$0xff]  ;;  %v504_v3 = vadd.f32 %v3562_v1, %v3559_v0  ;;  %v3570_v4 = vld [vmem:[%s3556_s17 + $0x8] sm:$0xff]  ;;  %v3576_v6 = vld [vmem:[%s3551_s23 + $0x18] sm:$0xff]  ;;  %1132 = vmatprep.subr.bf16.mxu0 %v2994_v51  ;;  %s4903_s21 = scalar_lea.hbm %s4959_s8, %s2850_s24 }
  0x3e   : > { %v456_v7 = vadd.f32 %v3570_v4, %v3565_v2  ;;  %v3581_v8 = vld [vmem:[%s3556_s17 + $0x10] sm:$0xff]  ;;  %v3584_v9 = vld [vmem:[%s3556_s17 + $0x18] sm:$0xff]  ;;  %v507_v10 = vadd.f32 %v3576_v6, %v3573_v5  ;;  %v3597_v14 = vld [vmem:[%s3556_s17 + $0x20] sm:$0xff] }
  0x3f   : > { %505 = vadd.xlane.f32.xlu1 %v504_v3  ;;  %v459_v11 = vadd.f32 %v3584_v9, %v3581_v8  ;;  %v3591_v12 = vld [vmem:[%s3556_s17 + $0x30] sm:$0xff]  ;;  %v3594_v13 = vld [vmem:[%s3556_s17 + $0x38] sm:$0xff]  ;;  %v3600_v15 = vld [vmem:[%s3556_s17 + $0x28] sm:$0xff] }
  0x40   : > { %457 = vadd.xlane.f32.xlu0 %v456_v7  ;;  %v465_v16 = vadd.f32 %v3594_v13, %v3591_v12  ;;  %v462_v17 = vadd.f32 %v3600_v15, %v3597_v14  ;;  %v3607_v18 = vld [vmem:[%s3551_s23 + $0x30] sm:$0xff]  ;;  %v3610_v19 = vld [vmem:[%s3551_s23 + $0x38] sm:$0xff]  ;;  %v3613_v20 = vld [vmem:[%s3551_s23 + $0x20] sm:$0xff]  ;;  %1133 = vmatpush1.bf16.msra.mxu0 %v2996_v57 }
  0x41   : > { %v3616_v21 = vld [vmem:[%s3551_s23 + $0x28] sm:$0xff]  ;;  %v513_v22 = vadd.f32 %v3610_v19, %v3607_v18  ;;  %v3623_v24 = vld [vmem:[%s3556_s17 + $0x50] sm:$0xff]  ;;  %v3626_v25 = vld [vmem:[%s3556_s17 + $0x58] sm:$0xff]  ;;  %1134 = vmatprep.subr.bf16.mxu0 %v2997_v59 }
  0x42   : > { %v510_v23 = vadd.f32 %v3616_v21, %v3613_v20  ;;  %v3629_v26 = vld [vmem:[%s3556_s17 + $0x40] sm:$0xff]  ;;  %v3632_v27 = vld [vmem:[%s3556_s17 + $0x48] sm:$0xff]  ;;  %v471_v28 = vadd.f32 %v3626_v25, %v3623_v24  ;;  %v3639_v30 = vld [vmem:[%s3551_s23 + $0x50] sm:$0xff] }
  0x43   : > { %508 = vadd.xlane.f32.xlu1 %v507_v10  ;;  %v468_v29 = vadd.f32 %v3632_v27, %v3629_v26  ;;  %v3642_v31 = vld [vmem:[%s3551_s23 + $0x58] sm:$0xff]  ;;  %v3645_v32 = vld [vmem:[%s3551_s23 + $0x40] sm:$0xff]  ;;  %v3648_v33 = vld [vmem:[%s3551_s23 + $0x48] sm:$0xff] }
  0x44   : > { %460 = vadd.xlane.f32.xlu0 %v459_v11  ;;  %v519_v34 = vadd.f32 %v3642_v31, %v3639_v30  ;;  %v516_v35 = vadd.f32 %v3648_v33, %v3645_v32  ;;  %v3655_v36 = vld [vmem:[%s3556_s17 + $0x70] sm:$0xff]  ;;  %v3658_v37 = vld [vmem:[%s3556_s17 + $0x78] sm:$0xff]  ;;  %v3661_v38 = vld [vmem:[%s3556_s17 + $0x60] sm:$0xff] }
  0x45   : > { %v3664_v39 = vld [vmem:[%s3556_s17 + $0x68] sm:$0xff]  ;;  %v3667_v40 = vld [vmem:[%s3551_s23 + $0x70] sm:$0xff]  ;;  %v3670_v41 = vld [vmem:[%s3551_s23 + $0x78] sm:$0xff]  ;;  %v477_v44 = vadd.f32 %v3658_v37, %v3655_v36 }
  0x46   : > { %v3681_v45 = vld [vmem:[%s3551_s23 + $0x60] sm:$0xff]  ;;  %v474_v47 = vadd.f32 %v3664_v39, %v3661_v38  ;;  %v3689_v48 = vld [vmem:[%s3551_s23 + $0x68] sm:$0xff]  ;;  %v3695_v50 = vld [vmem:[%s3556_s17 + $0x90] sm:$0xff]  ;;  %v525_v52 = vadd.f32 %v3670_v41, %v3667_v40 }
  0x47   : > { %466 = vadd.xlane.f32.xlu1 %v465_v16  ;;  %v3703_v53 = vld [vmem:[%s3556_s17 + $0x98] sm:$0xff]  ;;  %v3706_v54 = vld [vmem:[%s3556_s17 + $0x80] sm:$0xff]  ;;  %v522_v55 = vadd.f32 %v3689_v48, %v3681_v45  ;;  %v3711_v56 = vld [vmem:[%s3556_s17 + $0x88] sm:$0xff] }
  0x48   : > { %463 = vadd.xlane.f32.xlu0 %v462_v17  ;;  %v3717_v58 = vld [vmem:[%s3551_s23 + $0x90] sm:$0xff]  ;;  %v483_v60 = vadd.f32 %v3703_v53, %v3695_v50  ;;  %v3725_v61 = vld [vmem:[%s3551_s23 + $0x98] sm:$0xff]  ;;  %v3728_v62 = vld [vmem:[%s3551_s23 + $0x80] sm:$0xff]  ;;  %v480_v63 = vadd.f32 %v3711_v56, %v3706_v54 }
  0x49   : > { %v3733_v3 = vld [vmem:[%s3551_s23 + $0x88] sm:$0xff]  ;;  %v2999_v7 = vld [vmem:[%s4954_s3 + $0x30] ss:$8 sps:$4 sm:$0xff]   ;;  %v531_v16 = vadd.f32 %v3725_v61, %v3717_v58  ;;  %v3794_v59 = vld [vmem:[%s3556_s17 + $0xc0] sm:$0xff] }
  0x4a   : > { %v3739_v10 = vld [vmem:[%s3556_s17 + $0xb0] sm:$0xff]  ;;  %v3000_v11 = vld [vmem:[%s4954_s3 + $0x44] ss:$8 sps:$4 sm:$0xff]   ;;  %v3747_v17 = vld [vmem:[%s3556_s17 + $0xb8] sm:$0xff]  ;;  %1135 = vmatpush1.bf16.msra.mxu0 %v2999_v7  ;;  %4997 = vst [vmem:[#allocation12_spill] sm:$0xff] %v3794_v59 }
  0x4b   : > { %514 = vadd.xlane.f32.xlu1 %v513_v22  ;;  %v3750_v22 = vld [vmem:[%s3556_s17 + $0xa0] sm:$0xff]  ;;  %1136 = vmatprep.subr.bf16.mxu0 %v3000_v11  ;;  %v489_v42 = vadd.f32 %v3747_v17, %v3739_v10  ;;  %v3769_v43 = vld [vmem:[%s3551_s23 + $0xb8] sm:$0xff]  ;;  %v3783_v51 = vld [vmem:[%s3556_s17 + $0xd0] sm:$0xff] }
  0x4c   : > { %511 = vadd.xlane.f32.xlu0 %v510_v23  ;;  %4993 = vst [vmem:[#allocation8_spill] sm:$0xff] %v3750_v22  ;;  %v528_v23 = vadd.f32 %v3733_v3, %v3728_v62  ;;  %v3005_v49 = vld [vmem:[%s4954_s3 + $0x50] ss:$8 sps:$4 sm:$0xff]   ;;  %4995 = vst [vmem:[#allocation10_spill] sm:$0xff] %v3783_v51  ;;  %v3008_v7 = vld [vmem:[%s4954_s3 + $0x60] ss:$8 sps:$4 sm:$0xff]  }
  0x4d   : > { %v3791_v57 = vld [vmem:[%s3556_s17 + $0xd8] sm:$0xff]  ;;  %v3805_v11 = vld [vmem:[%s3551_s23 + $0xd0] sm:$0xff] }
  0x4e   : > { %4996 = vst [vmem:[#allocation11_spill] sm:$0xff] %v3791_v57  ;;  %4999 = vst [vmem:[#allocation14_spill] sm:$0xff] %v3805_v11 }
  0x4f   : > { %472 = vadd.xlane.f32.xlu1 %v471_v28  ;;  %v3755_v28 = vld [vmem:[%s3556_s17 + $0xa8] sm:$0xff] }
  0x50   : > { %469 = vadd.xlane.f32.xlu0 %v468_v29  ;;  %4994 = vst [vmem:[#allocation9_spill] sm:$0xff] %v3755_v28  ;;  %v3002_v29 = vld [vmem:[%s4954_s3 + $0x40] ss:$8 sps:$4 sm:$0xff]   ;;  %v486_v46 = vadd.f32 %v3755_v28, %v3750_v22 }
  0x51   : > { %1137 = vmatpush1.bf16.msra.mxu0 %v3002_v29  ;;  %v3813_v29 = vld [vmem:[%s3551_s23 + $0xd8] sm:$0xff]  ;;  %v3862_v28 = vld [vmem:[%s3551_s23 + $0xe0] sm:$0xff] }
  0x52   : > { %5000 = vst [vmem:[#allocation15_spill] sm:$0xff] %v3813_v29  ;;  %5009 = vst [vmem:[#allocation24_spill] sm:$0xff] %v3862_v28 }
  0x53   : > { %520 = vadd.xlane.f32.xlu1 %v519_v34  ;;  %v3761_v34 = vld [vmem:[%s3551_s23 + $0xb0] sm:$0xff] }
  0x54   : > { %517 = vadd.xlane.f32.xlu0 %v516_v35  ;;  %v3003_v35 = vld [vmem:[%s4954_s3 + $0x54] ss:$8 sps:$4 sm:$0xff]  }
  0x55   : > { %1138 = vmatprep.subr.bf16.mxu0 %v3003_v35  ;;  %v3816_v35 = vld [vmem:[%s3551_s23 + $0xc0] sm:$0xff] }
  0x56   : > { %1139 = vmatpush1.bf16.msra.mxu0 %v3005_v49  ;;  %5001 = vst [vmem:[#allocation16_spill] sm:$0xff] %v3816_v35  ;;  %v3011_v49 = vld [vmem:[%s4954_s3 + $0x70] ss:$8 sps:$4 sm:$0xff]  }
  0x57   : > { %478 = vadd.xlane.f32.xlu1 %v477_v44  ;;  %v3772_v44 = vld [vmem:[%s3551_s23 + $0xa0] sm:$0xff] }
  0x58   : > { %475 = vadd.xlane.f32.xlu0 %v474_v47  ;;  %v3777_v47 = vld [vmem:[%s3551_s23 + $0xa8] sm:$0xff] }
  0x5b   : > { %526 = vadd.xlane.f32.xlu1 %v525_v52  ;;  %v3006_v52 = vld [vmem:[%s4954_s3 + $0x64] ss:$8 sps:$4 sm:$0xff]  }
  0x5c   : > { %523 = vadd.xlane.f32.xlu0 %v522_v55  ;;  %v537_v55 = vadd.f32 %v3769_v43, %v3761_v34  ;;  %1140 = vmatprep.subr.bf16.mxu0 %v3006_v52  ;;  %v3827_v52 = vld [vmem:[%s3556_s17 + $0xf0] sm:$0xff] }
  0x5d   : > { %1141 = vmatpush1.bf16.msra.mxu0 %v3008_v7  ;;  %5003 = vst [vmem:[#allocation18_spill] sm:$0xff] %v3827_v52  ;;  %v3838_v7 = vld [vmem:[%s3556_s17 + $0xe0] sm:$0xff] }
  0x5e   : > { %5005 = vst [vmem:[#allocation20_spill] sm:$0xff] %v3838_v7 }
  0x5f   : > { %484 = vadd.xlane.f32.xlu1 %v483_v60  ;;  %v534_v60 = vadd.f32 %v3777_v47, %v3772_v44 }
  0x60   : > { %481 = vadd.xlane.f32.xlu0 %v480_v63  ;;  %v3799_v63 = vld [vmem:[%s3556_s17 + $0xc8] sm:$0xff] }
  0x61   : > { %4998 = vst [vmem:[#allocation13_spill] sm:$0xff] %v3799_v63 }
  0x63   : > { %532 = vadd.xlane.f32.xlu1 %v531_v16  ;;  %v3009_v16 = vld [vmem:[%s4954_s3 + $0x74] ss:$8 sps:$4 sm:$0xff]  }
  0x64   : > { %529 = vadd.xlane.f32.xlu0 %v528_v23  ;;  %v495_v23 = vadd.f32 %v3791_v57, %v3783_v51  ;;  %1142 = vmatprep.subr.bf16.mxu0 %v3009_v16  ;;  %v3014_v57 = vld [vmem:[%s4954_s3 + $0x80] ss:$8 sps:$4 sm:$0xff]   ;;  %v3852_v51 = vld [vmem:[%s3551_s23 + $0xf0] sm:$0xff] }
  0x65   : > { %1143 = vmatpush1.bf16.msra.mxu0 %v3011_v49  ;;  %5007 = vst [vmem:[#allocation22_spill] sm:$0xff] %v3852_v51  ;;  %v3017_v49 = vld [vmem:[%s4954_s3 + $0x90] ss:$8 sps:$4 sm:$0xff]  }
  0x67   : > { %490 = vadd.xlane.f32.xlu1 %v489_v42  ;;  %v492_v42 = vadd.f32 %v3799_v63, %v3794_v59  ;;  %v543_v63 = vadd.f32 %v3813_v29, %v3805_v11  ;;  %v3841_v59 = vld [vmem:[%s3556_s17 + $0xe8] sm:$0xff]  ;;  %v3855_v11 = vld [vmem:[%s3551_s23 + $0xf8] sm:$0xff] }
  0x68   : > { %487 = vadd.xlane.f32.xlu0 %v486_v46  ;;  %v3821_v46 = vld [vmem:[%s3551_s23 + $0xc8] sm:$0xff]  ;;  %5006 = vst [vmem:[#allocation21_spill] sm:$0xff] %v3841_v59  ;;  %5008 = vst [vmem:[#allocation23_spill] sm:$0xff] %v3855_v11 }
  0x69   : > { %5002 = vst [vmem:[#allocation17_spill] sm:$0xff] %v3821_v46  ;;  %v540_v16 = vadd.f32 %v3821_v46, %v3816_v35  ;;  %v3865_v35 = vld [vmem:[%s3551_s23 + $0xe8] sm:$0xff]  ;;  %s2722_s23 = sshll.u32 %s5061_s27, 3 }
  0x6a   : > { %5010 = vst [vmem:[#allocation25_spill] sm:$0xff] %v3865_v35  ;;  %s4490_s22 = scalar_lea.vmem %s4960_s9, %s2722_s23 }
  0x6b   : > { %538 = vadd.xlane.f32.xlu1 %v537_v55  ;;  %v3830_v55 = vld [vmem:[%s3556_s17 + $0xf8] sm:$0xff]  ;;  %s360_s17 = sand.u32 1, %s3394_s10  }
  0x6c   : > { %535 = vadd.xlane.f32.xlu0 %v534_v60  ;;  %5004 = vst [vmem:[#allocation19_spill] sm:$0xff] %v3830_v55  ;;  %v3012_v60 = vld [vmem:[%s4954_s3 + $0x84] ss:$8 sps:$4 sm:$0xff]   ;;  %v501_v29 = vadd.f32 %v3830_v55, %v3827_v52  ;;  %s4752_s26 = sshll.u32 %s360_s17, 7  ;;  %s4910_s16 = scalar_lea.sflag [#allocation4], %s360_s17 }
  0x6d   : > { %1144 = vmatprep.subr.bf16.mxu0 %v3012_v60  ;;  %v549_v60 = vadd.f32 %v3855_v11, %v3852_v51  ;;  %s4770_s28 = scalar_lea.vmem [#allocation5], %s4752_s26 }
  0x6e   : > { %1145 = vmatpush1.bf16.msra.mxu0 %v3014_v57  ;;  %v546_v57 = vadd.f32 %v3865_v35, %v3862_v28  ;;  %s2593_s29 = sshll.u32 %s4770_s28, 4  ;;  %s4905_s29 = int_to_ptr.vmem [resolvable:$true] %s2593_s29 }
  0x6f   : > { %496 = vadd.xlane.f32.xlu1 %v495_v23  ;;  %v3015_v23 = vld [vmem:[%s4954_s3 + $0x94] ss:$8 sps:$4 sm:$0xff]   ;;  %s3336_s13 = scalar_lea.vmem %s4905_s29, 2048 }
  0x70   : > { %493 = vadd.xlane.f32.xlu0 %v492_v42  ;;  %v498_v42 = vadd.f32 %v3841_v59, %v3838_v7  ;;  %1146 = vmatprep.subr.bf16.mxu0 %v3015_v23  ;;  %v3021_v59 = vld [vmem:[%s4954_s3 + $0xb4] ss:$8 sps:$4 sm:$0xff]   ;;  %v3024_v23 = vld [vmem:[%s4954_s3 + $0xc4] ss:$8 sps:$4 sm:$0xff]   ;;  %p3337_p6 = scmp.ne.s32.totalorder %s4905_s29, %s3336_s13 }
  0x72   : > { %1147 = vmatpush1.bf16.msra.mxu0 %v3017_v49  ;;  %v3027_v49 = vld [vmem:[%s4954_s3 + $0xd4] ss:$8 sps:$4 sm:$0xff]   ;;  %p3338_p10 = pnand %p3337_p6, %p5054_p9 }
  0x73   : > { %544 = vadd.xlane.f32.xlu1 %v543_v63  ;;  %v3018_v63 = vld [vmem:[%s4954_s3 + $0xa4] ss:$8 sps:$4 sm:$0xff]  }
  0x74   : > { %541 = vadd.xlane.f32.xlu0 %v540_v16  ;;  %v3020_v16 = vld [vmem:[%s4954_s3 + $0xa0] ss:$8 sps:$4 sm:$0xff]   ;;  %1148 = vmatprep.subr.bf16.mxu0 %v3018_v63  ;;  %v3029_v63 = vld [vmem:[%s4954_s3 + $0xd0] ss:$8 sps:$4 sm:$0xff]   ;;  %p3339_p12 = pneg %p3338_p10 }
  0x76   : > { %1149 = vmatpush1.bf16.msra.mxu0 %v3020_v16  ;;  %v3033_v16 = vld [vmem:[%s4954_s3 + $0xf4] ss:$8 sps:$4 sm:$0xff]  }
  0x77   : > { %502 = vadd.xlane.f32.xlu1 %v501_v29  ;;  %v3023_v29 = vld [vmem:[%s4954_s3 + $0xb0] ss:$8 sps:$4 sm:$0xff]   ;;  %1150 = vmatprep.subr.bf16.mxu0 %v3021_v59  ;;  %v3030_v59 = vld [vmem:[%s4954_s3 + $0xe4] ss:$8 sps:$4 sm:$0xff]  }
  0x78   : > { %499 = vadd.xlane.f32.xlu0 %v498_v42  ;;  %v3026_v42 = vld [vmem:[%s4954_s3 + $0xc0] ss:$8 sps:$4 sm:$0xff]  }
  0x7a   : > { %1151 = vmatpush1.bf16.msra.mxu0 %v3023_v29  ;;  %v3038_v29 = vld [vmem:[%s4953_s2 + $0x4] ss:$8 sps:$4 sm:$0xff]  }
  0x7b   : > { %550 = vadd.xlane.f32.xlu1 %v549_v60  ;;  %1152 = vmatprep.subr.bf16.mxu0 %v3024_v23  ;;  %v3032_v60 = vld [vmem:[%s4954_s3 + $0xe0] ss:$8 sps:$4 sm:$0xff]  }
  0x7c   : > { %547 = vadd.xlane.f32.xlu0 %v546_v57  ;;  %v3035_v57 = vld [vmem:[%s4954_s3 + $0xf0] ss:$8 sps:$4 sm:$0xff]  }
  0x7e   : > { %1153 = vmatpush1.bf16.msra.mxu0 %v3026_v42 }
  0x7f   : > { %1154 = vmatprep.subr.bf16.mxu0 %v3027_v49 }
  0x82   : > { %1155 = vmatpush1.bf16.msra.mxu0 %v3029_v63 }
  0x83   : > { %1156 = vmatprep.subr.bf16.mxu0 %v3030_v59 }
  0x86   : > { %1157 = vmatpush1.bf16.msra.mxu0 %v3032_v60 }
  0x87   : > { %1158 = vmatprep.subr.bf16.mxu0 %v3033_v16 }
  0x8a   : > { %1159 = vmatpush1.bf16.msra.mxu0 %v3035_v57 }
  0x8b   : > { %1401 = vmatprep.subr.bf16.mxu0 %v3038_v29 }
  0xcc   : > { %v506_v23 = vpop.xlane.xlu1 %505 }
  0xcd   : > { %v458_v42 = vpop.xlane.xlu0 %457 }
  0xce   : > { %v552_v49 = vadd.f32 %v506_v23, %v458_v42 }
  0xd0   : > { %v568_v63 = vmul.f32 0.001953125, %v552_v49  ;;  %v509_v59 = vpop.xlane.xlu1 %508 }
  0xd1   : > { %v461_v7 = vpop.xlane.xlu0 %460 }
  0xd2   : > { %v553_v55 = vadd.f32 %v509_v59, %v461_v7  ;;  %v3914_v60 = vsub.f32 %v3565_v2, %v568_v63  ;;  %v3917_v52 = vsub.f32 %v3570_v4, %v568_v63  ;;  %v617_v16 = vsub.f32 %v3562_v1, %v568_v63 }
  0xd3   : > { %v616_v28 = vsub.f32 %v3559_v0, %v568_v63 }
  0xd4   : > { %5011 = vst [vmem:[#allocation26_spill] sm:$0xff] %v3914_v60  ;;  %5012 = vst [vmem:[#allocation27_spill] sm:$0xff] %v3917_v52  ;;  %v569_v35 = vmul.f32 0.001953125, %v553_v55  ;;  %v467_v57 = vpop.xlane.xlu1 %466  ;;  %v648_v29 = vmul.f32 %v3914_v60, %v3914_v60  ;;  %v649_v23 = vmul.f32 %v3917_v52, %v3917_v52  ;;  %v729_v49 = vmul.f32 %v617_v16, %v617_v16  ;;  %v3036_v52 = vld [vmem:[%s4953_s2] ss:$8 sps:$4 sm:$0xff]  }
  0xd5   : > { %v464_v42 = vpop.xlane.xlu0 %463  ;;  %v728_v7 = vmul.f32 %v616_v28, %v616_v28 }
  0xd6   : > { %v680_v2 = vadd.f32 %v649_v23, %v648_v29  ;;  %v619_v59 = vsub.f32 %v3576_v6, %v569_v35  ;;  %v618_v4 = vsub.f32 %v3573_v5, %v569_v35  ;;  %v3928_v1 = vsub.f32 %v3581_v8, %v569_v35 }
  0xd7   : > { %v3931_v0 = vsub.f32 %v3584_v9, %v569_v35  ;;  %v3041_v35 = vld [vmem:[%s4953_s2 + $0x14] ss:$8 sps:$4 sm:$0xff]  }
  0xd8   : > { %681 = vadd.xlane.f32.xlu0 %v680_v2  ;;  %v515_v55 = vpop.xlane.xlu1 %514  ;;  %v921_v63 = vpack.c.bf16 %v619_v59, %v617_v16  ;;  %v920_v51 = vpack.c.bf16 %v618_v4, %v616_v28  ;;  %v650_v29 = vmul.f32 %v3928_v1, %v3928_v1  ;;  %v730_v16 = vmul.f32 %v618_v4, %v618_v4 }
  0xd9   : > { %v555_v6 = vadd.f32 %v515_v55, %v467_v57  ;;  %v512_v8 = vpop.xlane.xlu0 %511  ;;  %v651_v9 = vmul.f32 %v3931_v0, %v3931_v0  ;;  %v731_v23 = vmul.f32 %v619_v59, %v619_v59  ;;  %v760_v28 = vadd.f32 %v729_v49, %v728_v7  ;;  %v3039_v55 = vld [vmem:[%s4953_s2 + $0x10] ss:$8 sps:$4 sm:$0xff]  }
  0xda   : > { %v554_v2 = vadd.f32 %v512_v8, %v464_v42  ;;  %1160 = vmatprep.mubr.bf16.mxu0 %v921_v63  ;;  %v3044_v42 = vld [vmem:[%s4953_s2 + $0x24] ss:$8 sps:$4 sm:$0xff]  }
  0xdb   : > { %v571_v11 = vmul.f32 0.001953125, %v555_v6  ;;  %1161 = vmatmul.mubr.bf16.vlgmr.msra.gmra.mrb[0].mxu0 %v920_v51  ;;  %v683_v46 = vadd.f32 %v651_v9, %v650_v29  ;;  %v763_v5 = vadd.f32 %v731_v23, %v730_v16 }
  0xdc   : > { %v570_v22 = vmul.f32 0.001953125, %v554_v2  ;;  %1402 = vmatpush1.bf16.msra.mxu0 %v3036_v52  ;;  %761 = vadd.xlane.f32.xlu0 %v760_v28  ;;  %v473_v57 = vpop.xlane.xlu1 %472 }
  0xdd   : > { %684 = vadd.xlane.f32.xlu1 %v683_v46  ;;  %v470_v60 = vpop.xlane.xlu0 %469  ;;  %1403 = vmatprep.subr.bf16.mxu0 %v3041_v35  ;;  %v623_v59 = vsub.f32 %v3610_v19, %v571_v11  ;;  %v622_v51 = vsub.f32 %v3607_v18, %v571_v11  ;;  %v3954_v52 = vsub.f32 %v3591_v12, %v571_v11  ;;  %v3047_v35 = vld [vmem:[%s4953_s2 + $0x34] ss:$8 sps:$4 sm:$0xff]  }
  0xde   : > { %v621_v7 = vsub.f32 %v3616_v21, %v570_v22  ;;  %v620_v49 = vsub.f32 %v3613_v20, %v570_v22  ;;  %v3959_v4 = vsub.f32 %v3594_v13, %v571_v11  ;;  %v3962_v46 = vsub.f32 %v3597_v14, %v570_v22  ;;  %v3042_v20 = vld [vmem:[%s4953_s2 + $0x20] ss:$8 sps:$4 sm:$0xff]  }
  0xdf   : > { %v654_v19 = vmul.f32 %v3954_v52, %v3954_v52  ;;  %v3967_v63 = vsub.f32 %v3600_v15, %v570_v22  ;;  %v734_v18 = vmul.f32 %v622_v51, %v622_v51  ;;  %v735_v29 = vmul.f32 %v623_v59, %v623_v59 }
  0xe0   : > { %1404 = vmatpush1.bf16.msra.mxu0 %v3039_v55  ;;  %v521_v12 = vpop.xlane.xlu1 %520  ;;  %v923_v6 = vpack.c.bf16 %v623_v59, %v621_v7  ;;  %v922_v13 = vpack.c.bf16 %v622_v51, %v620_v49  ;;  %v655_v14 = vmul.f32 %v3959_v4, %v3959_v4  ;;  %v652_v21 = vmul.f32 %v3962_v46, %v3962_v46 }
  0xe1   : > { %764 = vadd.xlane.f32.xlu1 %v763_v5  ;;  %v557_v11 = vadd.f32 %v521_v12, %v473_v57  ;;  %v518_v15 = vpop.xlane.xlu0 %517  ;;  %1405 = vmatprep.subr.bf16.mxu0 %v3044_v42  ;;  %v653_v22 = vmul.f32 %v3967_v63, %v3967_v63  ;;  %v732_v16 = vmul.f32 %v620_v49, %v620_v49 }
  0xe2   : > { %v556_v8 = vadd.f32 %v518_v15, %v470_v60  ;;  %1170 = vmatprep.mubr.bf16.mxu0 %v923_v6  ;;  %v689_v9 = vadd.f32 %v655_v14, %v654_v19  ;;  %v733_v23 = vmul.f32 %v621_v7, %v621_v7  ;;  %v874_v5 = vpack.c.bf16 %v3954_v52, %v3962_v46  ;;  %v3045_v60 = vld [vmem:[%s4953_s2 + $0x30] ss:$8 sps:$4 sm:$0xff]   ;;  %v3050_v6 = vld [vmem:[%s4953_s2 + $0x44] ss:$8 sps:$4 sm:$0xff]   ;;  %v3090_v52 = vld [vmem:[#allocation2 + $0x34] ss:$12 sps:$4 sm:$0xff]  }
  0xe3   : > { %v573_v2 = vmul.f32 0.001953125, %v557_v11  ;;  %1171 = vmatmul.mubr.bf16.gmra.mrb[4].mxu0 %v922_v13  ;;  %v686_v28 = vadd.f32 %v653_v22, %v652_v21  ;;  %v769_v59 = vadd.f32 %v735_v29, %v734_v18  ;;  %v3092_v46 = vld [vmem:[#allocation2 + $0x30] ss:$12 sps:$4 sm:$0xff]  }
  0xe4   : > { %v572_v57 = vmul.f32 0.001953125, %v556_v8  ;;  %1406 = vmatpush1.bf16.msra.mxu0 %v3042_v20  ;;  %v479_v55 = vpop.xlane.xlu1 %478  ;;  %v766_v42 = vadd.f32 %v733_v23, %v732_v16 }
  0xe5   : > { %690 = vadd.xlane.f32.xlu1 %v689_v9  ;;  %687 = vadd.xlane.f32.xlu0 %v686_v28  ;;  %v476_v51 = vpop.xlane.xlu0 %475  ;;  %v627_v7 = vsub.f32 %v3642_v31, %v573_v2  ;;  %v626_v49 = vsub.f32 %v3639_v30, %v573_v2  ;;  %v3989_v19 = vsub.f32 %v3623_v24, %v573_v2  ;;  %v3053_v9 = vld [vmem:[%s4953_s2 + $0x54] ss:$8 sps:$4 sm:$0xff]  }
  0xe6   : > { %1407 = vmatprep.subr.bf16.mxu0 %v3047_v35  ;;  %v625_v12 = vsub.f32 %v3648_v33, %v572_v57  ;;  %v624_v18 = vsub.f32 %v3645_v32, %v572_v57  ;;  %v3997_v29 = vsub.f32 %v3626_v25, %v573_v2  ;;  %v4000_v20 = vsub.f32 %v3629_v26, %v572_v57  ;;  %v3048_v32 = vld [vmem:[%s4953_s2 + $0x40] ss:$8 sps:$4 sm:$0xff]  }
  0xe7   : > { %v658_v30 = vmul.f32 %v3989_v19, %v3989_v19  ;;  %v4005_v24 = vsub.f32 %v3632_v27, %v572_v57  ;;  %v738_v31 = vmul.f32 %v626_v49, %v626_v49  ;;  %v739_v33 = vmul.f32 %v627_v7, %v627_v7 }
  0xe8   : > { %1408 = vmatpush1.bf16.msra.mxu0 %v3045_v60  ;;  %v527_v13 = vpop.xlane.xlu1 %526  ;;  %v925_v14 = vpack.c.bf16 %v627_v7, %v625_v12  ;;  %v924_v25 = vpack.c.bf16 %v626_v49, %v624_v18  ;;  %v659_v26 = vmul.f32 %v3997_v29, %v3997_v29  ;;  %v656_v21 = vmul.f32 %v4000_v20, %v4000_v20 }
  0xe9   : > { %770 = vadd.xlane.f32.xlu1 %v769_v59  ;;  %767 = vadd.xlane.f32.xlu0 %v766_v42  ;;  %v559_v27 = vadd.f32 %v527_v13, %v479_v55  ;;  %v524_v11 = vpop.xlane.xlu0 %523  ;;  %v657_v15 = vmul.f32 %v4005_v24, %v4005_v24  ;;  %v736_v35 = vmul.f32 %v624_v18, %v624_v18  ;;  %v3051_v55 = vld [vmem:[%s4953_s2 + $0x50] ss:$8 sps:$4 sm:$0xff]  }
  0xea   : > { %v558_v22 = vadd.f32 %v524_v11, %v476_v51  ;;  %1180 = vmatprep.mubr.bf16.mxu0 %v925_v14  ;;  %1409 = vmatprep.subr.bf16.mxu0 %v3050_v6  ;;  %v695_v8 = vadd.f32 %v659_v26, %v658_v30  ;;  %v737_v2 = vmul.f32 %v625_v12, %v625_v12  ;;  %v3056_v6 = vld [vmem:[%s4953_s2 + $0x64] ss:$8 sps:$4 sm:$0xff]   ;;  %v3059_v11 = vld [vmem:[%s4953_s2 + $0x74] ss:$8 sps:$4 sm:$0xff]  }
  0xeb   : > { %v575_v16 = vmul.f32 0.001953125, %v559_v27  ;;  %1181 = vmatmul.mubr.bf16.gmra.mrb[8].mxu0 %v924_v25  ;;  %v692_v23 = vadd.f32 %v657_v15, %v656_v21  ;;  %v775_v60 = vadd.f32 %v739_v33, %v738_v31  ;;  %v876_v59 = vpack.c.bf16 %v3989_v19, %v4000_v20  ;;  %v3095_v19 = vld [vmem:[#allocation2 + $0x48] ss:$12 sps:$4 sm:$0xff]  }
  0xec   : > { %v574_v28 = vmul.f32 0.001953125, %v558_v22  ;;  %1410 = vmatpush1.bf16.msra.mxu0 %v3048_v32  ;;  %v485_v57 = vpop.xlane.xlu1 %484  ;;  %v772_v51 = vadd.f32 %v737_v2, %v736_v35 }
  0xed   : > { %696 = vadd.xlane.f32.xlu1 %v695_v8  ;;  %693 = vadd.xlane.f32.xlu0 %v692_v23  ;;  %v482_v42 = vpop.xlane.xlu0 %481  ;;  %v631_v7 = vsub.f32 %v3670_v41, %v575_v16  ;;  %v630_v49 = vsub.f32 %v3667_v40, %v575_v16  ;;  %v4032_v30 = vsub.f32 %v3655_v36, %v575_v16  ;;  %v3057_v23 = vld [vmem:[%s4953_s2 + $0x70] ss:$8 sps:$4 sm:$0xff]  }
  0xee   : > { %1411 = vmatprep.subr.bf16.mxu0 %v3053_v9  ;;  %v629_v12 = vsub.f32 %v3689_v48, %v574_v28  ;;  %v628_v18 = vsub.f32 %v3681_v45, %v574_v28  ;;  %v4035_v31 = vsub.f32 %v3658_v37, %v575_v16  ;;  %v4038_v33 = vsub.f32 %v3661_v38, %v574_v28  ;;  %v3054_v45 = vld [vmem:[%s4953_s2 + $0x60] ss:$8 sps:$4 sm:$0xff]  }
  0xef   : > { %v4041_v40 = vsub.f32 %v3664_v39, %v574_v28  ;;  %v742_v41 = vmul.f32 %v630_v49, %v630_v49  ;;  %v743_v48 = vmul.f32 %v631_v7, %v631_v7  ;;  %v662_v37 = vmul.f32 %v4032_v30, %v4032_v30 }
  0xf0   : > { %1412 = vmatpush1.bf16.msra.mxu0 %v3051_v55  ;;  %v533_v13 = vpop.xlane.xlu1 %532  ;;  %v927_v14 = vpack.c.bf16 %v631_v7, %v629_v12  ;;  %v926_v36 = vpack.c.bf16 %v630_v49, %v628_v18  ;;  %v663_v38 = vmul.f32 %v4035_v31, %v4035_v31  ;;  %v660_v25 = vmul.f32 %v4038_v33, %v4038_v33  ;;  %v3062_v7 = vld [vmem:[%s4953_s2 + $0x84] ss:$8 sps:$4 sm:$0xff]  }
  0xf1   : > { %776 = vadd.xlane.f32.xlu1 %v775_v60  ;;  %773 = vadd.xlane.f32.xlu0 %v772_v51  ;;  %v561_v39 = vadd.f32 %v533_v13, %v485_v57  ;;  %v530_v32 = vpop.xlane.xlu0 %529  ;;  %v661_v26 = vmul.f32 %v4041_v40, %v4041_v40  ;;  %v740_v8 = vmul.f32 %v628_v18, %v628_v18 }
  0xf2   : > { %v560_v21 = vadd.f32 %v530_v32, %v482_v42  ;;  %1190 = vmatprep.mubr.bf16.mxu0 %v927_v14  ;;  %1413 = vmatprep.subr.bf16.mxu0 %v3056_v6  ;;  %v701_v27 = vadd.f32 %v663_v38, %v662_v37  ;;  %v741_v9 = vmul.f32 %v629_v12, %v629_v12  ;;  %v3065_v38 = vld [vmem:[%s4953_s2 + $0x94] ss:$8 sps:$4 sm:$0xff]  }
  0xf3   : > { %v577_v15 = vmul.f32 0.001953125, %v561_v39  ;;  %1191 = vmatmul.mubr.bf16.gmra.mrb[12].mxu0 %v926_v36  ;;  %v698_v22 = vadd.f32 %v661_v26, %v660_v25  ;;  %v781_v2 = vadd.f32 %v743_v48, %v742_v41  ;;  %v878_v28 = vpack.c.bf16 %v4032_v30, %v4038_v33  ;;  %v3099_v30 = vld [vmem:[#allocation2 + $0x7c] ss:$12 sps:$4 sm:$0xff]  }
  0xf4   : > { %v576_v35 = vmul.f32 0.001953125, %v560_v21  ;;  %1414 = vmatpush1.bf16.msra.mxu0 %v3054_v45  ;;  %v491_v16 = vpop.xlane.xlu1 %490  ;;  %v778_v55 = vadd.f32 %v741_v9, %v740_v8 }
  0xf5   : > { %702 = vadd.xlane.f32.xlu1 %v701_v27  ;;  %699 = vadd.xlane.f32.xlu0 %v698_v22  ;;  %v488_v57 = vpop.xlane.xlu0 %487  ;;  %v635_v60 = vsub.f32 %v3725_v61, %v577_v15  ;;  %v634_v42 = vsub.f32 %v3717_v58, %v577_v15  ;;  %v4070_v12 = vsub.f32 %v3695_v50, %v577_v15 }
  0xf6   : > { %1415 = vmatprep.subr.bf16.mxu0 %v3059_v11  ;;  %v633_v51 = vsub.f32 %v3733_v3, %v576_v35  ;;  %v632_v49 = vsub.f32 %v3728_v62, %v576_v35  ;;  %v4073_v6 = vsub.f32 %v3703_v53, %v577_v15  ;;  %v4076_v18 = vsub.f32 %v3706_v54, %v576_v35  ;;  %v3060_v62 = vld [vmem:[%s4953_s2 + $0x80] ss:$8 sps:$4 sm:$0xff]   ;;  %v3063_v11 = vld [vmem:[%s4953_s2 + $0x90] ss:$8 sps:$4 sm:$0xff]  }
  0xf7   : > { %v4079_v58 = vsub.f32 %v3711_v56, %v576_v35  ;;  %v746_v61 = vmul.f32 %v634_v42, %v634_v42  ;;  %v747_v3 = vmul.f32 %v635_v60, %v635_v60  ;;  %v666_v53 = vmul.f32 %v4070_v12, %v4070_v12 }
  0xf8   : > { %1416 = vmatpush1.bf16.msra.mxu0 %v3057_v23  ;;  %v539_v41 = vpop.xlane.xlu1 %538  ;;  %v929_v48 = vpack.c.bf16 %v635_v60, %v633_v51  ;;  %v928_v50 = vpack.c.bf16 %v634_v42, %v632_v49  ;;  %v667_v54 = vmul.f32 %v4073_v6, %v4073_v6  ;;  %v664_v14 = vmul.f32 %v4076_v18, %v4076_v18  ;;  %v5013_v42 = vld [vmem:[#allocation8_spill] sm:$0xff] }
  0xf9   : > { %782 = vadd.xlane.f32.xlu1 %v781_v2  ;;  %779 = vadd.xlane.f32.xlu0 %v778_v55  ;;  %v563_v56 = vadd.f32 %v539_v41, %v491_v16  ;;  %v536_v13 = vpop.xlane.xlu0 %535  ;;  %v665_v45 = vmul.f32 %v4079_v58, %v4079_v58  ;;  %v744_v25 = vmul.f32 %v632_v49, %v632_v49  ;;  %v3068_v2 = vld [vmem:[%s4953_s2 + $0xa4] ss:$8 sps:$4 sm:$0xff]  }
  0xfa   : > { %v562_v36 = vadd.f32 %v536_v13, %v488_v57  ;;  %1200 = vmatprep.mubr.bf16.mxu0 %v929_v48  ;;  %1417 = vmatprep.subr.bf16.mxu0 %v3062_v7  ;;  %v707_v37 = vadd.f32 %v667_v54, %v666_v53  ;;  %v745_v26 = vmul.f32 %v633_v51, %v633_v51 }
  0xfb   : > { %v579_v39 = vmul.f32 0.001953125, %v563_v56  ;;  %1201 = vmatmul.mubr.bf16.gmra.mrb[16].mxu0 %v928_v50  ;;  %v704_v32 = vadd.f32 %v665_v45, %v664_v14  ;;  %v787_v15 = vadd.f32 %v747_v3, %v746_v61  ;;  %v880_v22 = vpack.c.bf16 %v4070_v12, %v4076_v18  ;;  %v3071_v56 = vld [vmem:[%s4953_s2 + $0xb4] ss:$8 sps:$4 sm:$0xff]  }
  0xfc   : > { %v578_v21 = vmul.f32 0.001953125, %v562_v36  ;;  %1418 = vmatpush1.bf16.msra.mxu0 %v3060_v62  ;;  %v497_v27 = vpop.xlane.xlu1 %496  ;;  %v784_v9 = vadd.f32 %v745_v26, %v744_v25  ;;  %v3104_v12 = vld [vmem:[#allocation2 + $0x90] ss:$12 sps:$4 sm:$0xff]   ;;  %v3107_v18 = vld [vmem:[#allocation2 + $0xa8] ss:$12 sps:$4 sm:$0xff]  }
  0xfd   : > { %708 = vadd.xlane.f32.xlu1 %v707_v37  ;;  %705 = vadd.xlane.f32.xlu0 %v704_v32  ;;  %v494_v8 = vpop.xlane.xlu0 %493  ;;  %v639_v35 = vsub.f32 %v3769_v43, %v579_v39  ;;  %v638_v16 = vsub.f32 %v3761_v34, %v579_v39  ;;  %v4108_v55 = vsub.f32 %v3739_v10, %v579_v39  ;;  %v5014_v43 = vld [vmem:[#allocation9_spill] sm:$0xff] }
  0xfe   : > { %1419 = vmatprep.subr.bf16.mxu0 %v3065_v38  ;;  %v637_v23 = vsub.f32 %v3777_v47, %v578_v21  ;;  %v636_v57 = vsub.f32 %v3772_v44, %v578_v21  ;;  %v4111_v60 = vsub.f32 %v3747_v17, %v579_v39  ;;  %v4114_v51 = vsub.f32 %v5013_v42, %v578_v21  ;;  %v3066_v44 = vld [vmem:[%s4953_s2 + $0xa0] ss:$8 sps:$4 sm:$0xff]   ;;  %v3069_v39 = vld [vmem:[%s4953_s2 + $0xb0] ss:$8 sps:$4 sm:$0xff]  }
  0xff   : > { %v4117_v34 = vsub.f32 %v5014_v43, %v578_v21  ;;  %v750_v7 = vmul.f32 %v638_v16, %v638_v16  ;;  %v751_v47 = vmul.f32 %v639_v35, %v639_v35  ;;  %v670_v17 = vmul.f32 %v4108_v55, %v4108_v55  ;;  %v5015_v21 = vld [vmem:[#allocation15_spill] sm:$0xff] }
 0x100   : > { %1420 = vmatpush1.bf16.msra.mxu0 %v3063_v11  ;;  %v545_v49 = vpop.xlane.xlu1 %544  ;;  %v931_v61 = vpack.c.bf16 %v639_v35, %v637_v23  ;;  %v930_v10 = vpack.c.bf16 %v638_v16, %v636_v57  ;;  %v671_v3 = vmul.f32 %v4111_v60, %v4111_v60  ;;  %v668_v62 = vmul.f32 %v4114_v51, %v4114_v51  ;;  %v5016_v11 = vld [vmem:[#allocation14_spill] sm:$0xff]  ;;  %v3074_v35 = vld [vmem:[%s4953_s2 + $0xc4] ss:$8 sps:$4 sm:$0xff]   ;;  %v5020_v42 = vld [vmem:[#allocation11_spill] sm:$0xff] }
 0x101   : > { %788 = vadd.xlane.f32.xlu1 %v787_v15  ;;  %785 = vadd.xlane.f32.xlu0 %v784_v9  ;;  %v565_v41 = vadd.f32 %v545_v49, %v497_v27  ;;  %v542_v48 = vpop.xlane.xlu0 %541  ;;  %v669_v50 = vmul.f32 %v4117_v34, %v4117_v34  ;;  %v748_v45 = vmul.f32 %v636_v57, %v636_v57  ;;  %v5018_v16 = vld [vmem:[#allocation16_spill] sm:$0xff] }
 0x102   : > { %v564_v53 = vadd.f32 %v542_v48, %v494_v8  ;;  %1210 = vmatprep.mubr.bf16.mxu0 %v931_v61  ;;  %1421 = vmatprep.subr.bf16.mxu0 %v3068_v2  ;;  %v713_v54 = vadd.f32 %v671_v3, %v670_v17  ;;  %v749_v36 = vmul.f32 %v637_v23, %v637_v23  ;;  %v5017_v8 = vld [vmem:[#allocation17_spill] sm:$0xff]  ;;  %v5019_v2 = vld [vmem:[#allocation10_spill] sm:$0xff] }
 0x103   : > { %v581_v13 = vmul.f32 0.001953125, %v565_v41  ;;  %1211 = vmatmul.mubr.bf16.gmra.mrb[20].mxu0 %v930_v10  ;;  %v710_v14 = vadd.f32 %v669_v50, %v668_v62  ;;  %v882_v32 = vpack.c.bf16 %v4108_v55, %v4114_v51  ;;  %v793_v26 = vadd.f32 %v751_v47, %v750_v7  ;;  %v5021_v47 = vld [vmem:[#allocation12_spill] sm:$0xff]  ;;  %v5022_v61 = vld [vmem:[#allocation13_spill] sm:$0xff] }
 0x104   : > { %v580_v37 = vmul.f32 0.001953125, %v564_v53  ;;  %1422 = vmatpush1.bf16.msra.mxu0 %v3066_v44  ;;  %v503_v38 = vpop.xlane.xlu1 %502  ;;  %v790_v7 = vadd.f32 %v749_v36, %v748_v45  ;;  %v3072_v41 = vld [vmem:[%s4953_s2 + $0xc0] ss:$8 sps:$4 sm:$0xff]   ;;  %v3077_v36 = vld [vmem:[%s4953_s2 + $0xd4] ss:$8 sps:$4 sm:$0xff]   ;;  %v883_v20 = vpack.c.bf16 %v4111_v60, %v4117_v34 }
 0x105   : > { %714 = vadd.xlane.f32.xlu1 %v713_v54  ;;  %711 = vadd.xlane.f32.xlu0 %v710_v14  ;;  %v500_v25 = vpop.xlane.xlu0 %499  ;;  %v643_v27 = vsub.f32 %v5015_v21, %v581_v13  ;;  %v642_v15 = vsub.f32 %v5016_v11, %v581_v13  ;;  %v4146_v57 = vsub.f32 %v5019_v2, %v581_v13  ;;  %v5025_v2 = vld [vmem:[#allocation25_spill] sm:$0xff] }
 0x106   : > { %1423 = vmatprep.subr.bf16.mxu0 %v3071_v56  ;;  %v641_v9 = vsub.f32 %v5017_v8, %v580_v37  ;;  %v640_v23 = vsub.f32 %v5018_v16, %v580_v37  ;;  %v4149_v43 = vsub.f32 %v5020_v42, %v581_v13  ;;  %v4152_v49 = vsub.f32 %v5021_v47, %v580_v37  ;;  %v5023_v8 = vld [vmem:[#allocation23_spill] sm:$0xff]  ;;  %v5024_v16 = vld [vmem:[#allocation22_spill] sm:$0xff] }
 0x107   : > { %v4155_v44 = vsub.f32 %v5022_v61, %v580_v37  ;;  %v754_v10 = vmul.f32 %v642_v15, %v642_v15  ;;  %v674_v62 = vmul.f32 %v4146_v57, %v4146_v57  ;;  %v755_v37 = vmul.f32 %v643_v27, %v643_v27  ;;  %v5027_v47 = vld [vmem:[#allocation18_spill] sm:$0xff] }
 0x108   : > { %1424 = vmatpush1.bf16.msra.mxu0 %v3069_v39  ;;  %v551_v17 = vpop.xlane.xlu1 %550  ;;  %v933_v3 = vpack.c.bf16 %v643_v27, %v641_v9  ;;  %v932_v48 = vpack.c.bf16 %v642_v15, %v640_v23  ;;  %v675_v50 = vmul.f32 %v4149_v43, %v4149_v43  ;;  %v672_v56 = vmul.f32 %v4152_v49, %v4152_v49  ;;  %v3075_v15 = vld [vmem:[%s4953_s2 + $0xd0] ss:$8 sps:$4 sm:$0xff]  }
 0x109   : > { %794 = vadd.xlane.f32.xlu1 %v793_v26  ;;  %791 = vadd.xlane.f32.xlu0 %v790_v7  ;;  %v567_v53 = vadd.f32 %v551_v17, %v503_v38  ;;  %v548_v54 = vpop.xlane.xlu0 %547  ;;  %v673_v13 = vmul.f32 %v4155_v44, %v4155_v44  ;;  %v752_v38 = vmul.f32 %v640_v23, %v640_v23  ;;  %v5026_v23 = vld [vmem:[#allocation24_spill] sm:$0xff]  ;;  %v5028_v17 = vld [vmem:[#allocation19_spill] sm:$0xff] }
 0x10a   : > { %v566_v14 = vadd.f32 %v548_v54, %v500_v25  ;;  %1220 = vmatprep.mubr.bf16.mxu0 %v933_v3  ;;  %1425 = vmatprep.subr.bf16.mxu0 %v3074_v35  ;;  %v719_v45 = vadd.f32 %v675_v50, %v674_v62  ;;  %v753_v21 = vmul.f32 %v641_v9, %v641_v9  ;;  %v3080_v9 = vld [vmem:[%s4953_s2 + $0xe4] ss:$8 sps:$4 sm:$0xff]  }
 0x10b   : > { %v583_v39 = vmul.f32 0.001953125, %v567_v53  ;;  %1221 = vmatmul.mubr.bf16.gmra.mrb[24].mxu0 %v932_v48  ;;  %v716_v26 = vadd.f32 %v673_v13, %v672_v56  ;;  %v884_v25 = vpack.c.bf16 %v4146_v57, %v4152_v49  ;;  %v5029_v62 = vld [vmem:[#allocation20_spill] sm:$0xff]  ;;  %v5030_v53 = vld [vmem:[#allocation21_spill] sm:$0xff]  ;;  %v885_v33 = vpack.c.bf16 %v4149_v43, %v4155_v44 }
 0x10c   : > { %v582_v11 = vmul.f32 0.001953125, %v566_v14  ;;  %1426 = vmatpush1.bf16.msra.mxu0 %v3072_v41  ;;  %v799_v41 = vadd.f32 %v755_v37, %v754_v10  ;;  %v796_v48 = vadd.f32 %v753_v21, %v752_v38  ;;  %v3078_v13 = vld [vmem:[%s4953_s2 + $0xe0] ss:$8 sps:$4 sm:$0xff]   ;;  %v3083_v21 = vld [vmem:[%s4953_s2 + $0xf4] ss:$8 sps:$4 sm:$0xff]  }
 0x10d   : > { %720 = vadd.xlane.f32.xlu1 %v719_v45  ;;  %717 = vadd.xlane.f32.xlu0 %v716_v26  ;;  %v647_v35 = vsub.f32 %v5023_v8, %v583_v39  ;;  %v646_v27 = vsub.f32 %v5024_v16, %v583_v39  ;;  %v4184_v61 = vsub.f32 %v5027_v47, %v583_v39 }
 0x10e   : > { %1427 = vmatprep.subr.bf16.mxu0 %v3077_v36  ;;  %v645_v42 = vsub.f32 %v5025_v2, %v582_v11  ;;  %v644_v7 = vsub.f32 %v5026_v23, %v582_v11  ;;  %v4187_v3 = vsub.f32 %v5028_v17, %v583_v39  ;;  %v4190_v50 = vsub.f32 %v5029_v62, %v582_v11  ;;  %v5031_v36 = vld [vmem:[#allocation27_spill] sm:$0xff] }
 0x10f   : > { %v4193_v54 = vsub.f32 %v5030_v53, %v582_v11  ;;  %v678_v45 = vmul.f32 %v4184_v61, %v4184_v61  ;;  %v873_v37 = vpack.c.bf16 %v3931_v0, %v5031_v36  ;;  %v758_v11 = vmul.f32 %v646_v27, %v646_v27  ;;  %v3089_v17 = vld [vmem:[#allocation2 + $0x18] ss:$12 sps:$4 sm:$0xff]  }
 0x110   : > { %1428 = vmatpush1.bf16.msra.mxu0 %v3075_v15  ;;  %v935_v56 = vpack.c.bf16 %v647_v35, %v645_v42  ;;  %v934_v14 = vpack.c.bf16 %v646_v27, %v644_v7  ;;  %v679_v10 = vmul.f32 %v4187_v3, %v4187_v3  ;;  %v676_v39 = vmul.f32 %v4190_v50, %v4190_v50  ;;  %v5032_v27 = vld [vmem:[#allocation26_spill] sm:$0xff] }
 0x111   : > { %800 = vadd.xlane.f32.xlu1 %v799_v41  ;;  %797 = vadd.xlane.f32.xlu0 %v796_v48  ;;  %v677_v26 = vmul.f32 %v4193_v54, %v4193_v54  ;;  %v759_v15 = vmul.f32 %v647_v35, %v647_v35  ;;  %v756_v16 = vmul.f32 %v644_v7, %v644_v7  ;;  %v1548_v36 = vlaneseq }
 0x112   : > { %1230 = vmatprep.mubr.bf16.mxu0 %v935_v56  ;;  %1429 = vmatprep.subr.bf16.mxu0 %v3080_v9  ;;  %v725_v38 = vadd.f32 %v679_v10, %v678_v45  ;;  %v757_v2 = vmul.f32 %v645_v42, %v645_v42  ;;  %v886_v0 = vpack.c.bf16 %v4184_v61, %v4190_v50  ;;  %v3081_v9 = vld [vmem:[%s4953_s2 + $0xf0] ss:$8 sps:$4 sm:$0xff]  }
 0x113   : > { %1231 = vmatmul.mubr.bf16.gmra.mrb[28].mxu0 %v934_v14  ;;  %v722_v8 = vadd.f32 %v677_v26, %v676_v39  ;;  %v805_v23 = vadd.f32 %v759_v15, %v758_v11  ;;  %v875_v35 = vpack.c.bf16 %v3959_v4, %v3967_v63  ;;  %v5033_v42 = vpack.c.bf16 %v3928_v1, %v5032_v27  ;;  %v3084_v4 = vld [vmem:[#allocation2 + $0x4] ss:$12 sps:$4 sm:$0xff]   ;;  %v3086_v1 = vld [vmem:[#allocation2] ss:$12 sps:$4 sm:$0xff]   ;;  %v3087_v63 = vld [vmem:[#allocation2 + $0x1c] ss:$12 sps:$4 sm:$0xff]  }
 0x114   : > { %1430 = vmatpush1.bf16.msra.mxu0 %v3078_v13  ;;  %1433 = vmatprep.mubr.bf16.mxu0 %v873_v37  ;;  %v802_v47 = vadd.f32 %v757_v2, %v756_v16  ;;  %v877_v7 = vpack.c.bf16 %v3997_v29, %v4005_v24  ;;  %v879_v61 = vpack.c.bf16 %v4035_v31, %v4041_v40  ;;  %v3096_v24 = vld [vmem:[#allocation2 + $0x64] ss:$12 sps:$4 sm:$0xff]   ;;  %v4258_v11 = vshrl.u32 %v1548_v36, 7 }
 0x115   : > { %726 = vadd.xlane.f32.xlu1 %v725_v38  ;;  %723 = vadd.xlane.f32.xlu0 %v722_v8  ;;  %v881_v29 = vpack.c.bf16 %v4073_v6, %v4079_v58  ;;  %v3101_v31 = vld [vmem:[#allocation2 + $0x78] ss:$12 sps:$4 sm:$0xff]   ;;  %v887_v40 = vpack.c.bf16 %v4187_v3, %v4193_v54  ;;  %v3407_v58 = vmov 0  }
 0x116   : > { %1431 = vmatprep.subr.bf16.mxu0 %v3083_v21  ;;  %2047 = vmatprep.subr.bf16.mxu1 %v3084_v4  ;;  %v3105_v6 = vld [vmem:[#allocation2 + $0xac] ss:$12 sps:$4 sm:$0xff]  }
 0x117   : > { %2048 = vmatpush1.bf16.msra.mxu1 %v3086_v1  ;;  %2079 = vmatprep.mubr.bf16.mxu1 %v3407_v58 }
 0x118   : > { %1432 = vmatpush1.bf16.msra.mxu0 %v3081_v9  ;;  %2049 = vmatprep.subr.bf16.mxu1 %v3087_v63 }
 0x119   : > { %806 = vadd.xlane.f32.xlu1 %v805_v23  ;;  %803 = vadd.xlane.f32.xlu0 %v802_v47  ;;  %v1546_v47 = vld [vmem:[%s4955_s4] sm:$0x3] }
 0x11a   : > { %2987 = vset.pattern.permute.xlu1 %v3407_v58  ;;  %2986 = vset.pattern.permute.xlu0 %v3407_v58 }
 0x11b   : > { %1434 = vmatmul.mubr.bf16.vlgmr.msra.gmra.mrb[0].mxu0 %v5033_v42  ;;  %2050 = vmatpush1.bf16.msra.mxu1 %v3089_v17 }
 0x11c   : > { %1443 = vmatprep.mubr.bf16.mxu0 %v875_v35  ;;  %2051 = vmatprep.subr.bf16.mxu1 %v3090_v52 }
 0x11f   : > { %2052 = vmatpush1.bf16.msra.mxu1 %v3092_v46 }
 0x123   : > { %1444 = vmatmul.mubr.bf16.gmra.mrb[4].mxu0 %v874_v5  ;;  %v3093_v5 = vld [vmem:[#allocation2 + $0x4c] ss:$12 sps:$4 sm:$0xff]  }
 0x124   : > { %1453 = vmatprep.mubr.bf16.mxu0 %v877_v7  ;;  %2053 = vmatprep.subr.bf16.mxu1 %v3093_v5 }
 0x125   : > { %2054 = vmatpush1.bf16.msra.mxu1 %v3095_v19 }
 0x126   : > { %2055 = vmatprep.subr.bf16.mxu1 %v3096_v24 }
 0x12b   : > { %1454 = vmatmul.mubr.bf16.gmra.mrb[8].mxu0 %v876_v59  ;;  %v3098_v59 = vld [vmem:[#allocation2 + $0x60] ss:$12 sps:$4 sm:$0xff]  }
 0x12c   : > { %1463 = vmatprep.mubr.bf16.mxu0 %v879_v61  ;;  %2056 = vmatpush1.bf16.msra.mxu1 %v3098_v59 }
 0x12d   : > { %2057 = vmatprep.subr.bf16.mxu1 %v3099_v30 }
 0x130   : > { %2058 = vmatpush1.bf16.msra.mxu1 %v3101_v31 }
 0x133   : > { %1464 = vmatmul.mubr.bf16.gmra.mrb[12].mxu0 %v878_v28  ;;  %v3102_v28 = vld [vmem:[#allocation2 + $0x94] ss:$12 sps:$4 sm:$0xff]  }
 0x134   : > { %1473 = vmatprep.mubr.bf16.mxu0 %v881_v29  ;;  %2059 = vmatprep.subr.bf16.mxu1 %v3102_v28 }
 0x135   : > { %2060 = vmatpush1.bf16.msra.mxu1 %v3104_v12 }
 0x136   : > { %2061 = vmatprep.subr.bf16.mxu1 %v3105_v6 }
 0x139   : > { %2062 = vmatpush1.bf16.msra.mxu1 %v3107_v18  ;;  %v3109_v18 = vld [vmem:[#allocation2 + $0x20] ss:$12 sps:$4 sm:$0xff]  }
 0x13b   : > { %1474 = vmatmul.mubr.bf16.gmra.mrb[16].mxu0 %v880_v22  ;;  %v4254_v22 = vld [vmem:[#allocation2 + $0x8] ss:$12 sps:$4 sm:$0xff]  }
 0x13c   : > { %1483 = vmatprep.mubr.bf16.mxu0 %v883_v20  ;;  %2867 = vmatprep.subr.bf16.mxu1 %v4254_v22 }
 0x143   : > { %1484 = vmatmul.mubr.bf16.gmra.mrb[20].mxu0 %v882_v32 }
 0x144   : > { %1493 = vmatprep.mubr.bf16.mxu0 %v885_v33 }
 0x14b   : > { %1494 = vmatmul.mubr.bf16.gmra.mrb[24].mxu0 %v884_v25 }
 0x14c   : > { %1503 = vmatprep.mubr.bf16.mxu0 %v887_v40 }
 0x153   : > { %1504 = vmatmul.mubr.bf16.gmra.mrb[28].mxu0 %v886_v0  ;;  %v4261_v0 = vsub.s32 0, %v4258_v11 }
 0x155   : > { %v4267_v42 = vrot.slane %v1546_v47, %v4261_v0 }
 0x165   : > { %v682_v55 = vpop.xlane.xlu0 %681 }
 0x169   : > { %v762_v51 = vpop.xlane.xlu0 %761 }
 0x16a   : > { %v685_v60 = vpop.xlane.xlu1 %684  ;;  %v808_v62 = vadd.f32 %v762_v51, %v682_v55  ;;  %v4281_v51 = vsub.s32 1, %v4258_v11 }
 0x16c   : > { %v824_v54 = vmul.f32 0.001953125, %v808_v62 }
 0x16e   : > { %v765_v34 = vpop.xlane.xlu1 %764  ;;  %v840_v45 = vadd.f32 1e-05, %v824_v54 }
 0x16f   : > { %v809_v53 = vadd.f32 %v765_v34, %v685_v60 }
 0x170   : > { %3116 = vrsqrt.f32 %v840_v45 }
 0x171   : > { %v825_v13 = vmul.f32 0.001953125, %v809_v53 }
 0x172   : > { %v688_v32 = vpop.xlane.xlu0 %687  ;;  %v691_v57 = vpop.xlane.xlu1 %690 }
 0x173   : > { %v841_v37 = vadd.f32 1e-05, %v825_v13 }
 0x175   : > { %3118 = vrsqrt.f32 %v841_v37 }
 0x176   : > { %v768_v43 = vpop.xlane.xlu0 %767  ;;  %v771_v49 = vpop.xlane.xlu1 %770 }
 0x177   : > { %v810_v10 = vadd.f32 %v768_v43, %v688_v32  ;;  %v811_v39 = vadd.f32 %v771_v49, %v691_v57 }
 0x179   : > { %v826_v38 = vmul.f32 0.001953125, %v810_v10  ;;  %v827_v15 = vmul.f32 0.001953125, %v811_v39 }
 0x17a   : > { %v694_v44 = vpop.xlane.xlu0 %693  ;;  %v697_v25 = vpop.xlane.xlu1 %696 }
 0x17b   : > { %v842_v8 = vadd.f32 1e-05, %v826_v38  ;;  %v843_v9 = vadd.f32 1e-05, %v827_v15  ;;  %v4269_v7 = vpop.eup %3116 }
 0x17d   : > { %3120 = vrsqrt.f32 %v842_v8 }
 0x17e   : > { %v774_v3 = vpop.xlane.xlu0 %773  ;;  %v777_v41 = vpop.xlane.xlu1 %776  ;;  %3122 = vrsqrt.f32 %v843_v9 }
 0x17f   : > { %v812_v16 = vadd.f32 %v774_v3, %v694_v44  ;;  %v813_v23 = vadd.f32 %v777_v41, %v697_v25  ;;  %v3119_v29 = vpop.eup %3118 }
 0x181   : > { %v828_v27 = vmul.f32 0.001953125, %v812_v16  ;;  %v829_v61 = vmul.f32 0.001953125, %v813_v23 }
 0x182   : > { %v700_v48 = vpop.xlane.xlu0 %699  ;;  %v703_v50 = vpop.xlane.xlu1 %702 }
 0x183   : > { %v844_v52 = vadd.f32 1e-05, %v828_v27  ;;  %v845_v30 = vadd.f32 1e-05, %v829_v61 }
 0x185   : > { %3124 = vrsqrt.f32 %v844_v52 }
 0x186   : > { %v780_v56 = vpop.xlane.xlu0 %779  ;;  %v783_v14 = vpop.xlane.xlu1 %782  ;;  %3126 = vrsqrt.f32 %v845_v30  ;;  %v3112_v30 = vld [vmem:[#allocation2 + $0x68] ss:$12 sps:$4 sm:$0xff]  }
 0x187   : > { %v814_v46 = vadd.f32 %v780_v56, %v700_v48  ;;  %v815_v31 = vadd.f32 %v783_v14, %v703_v50  ;;  %v3121_v55 = vpop.eup %3120  ;;  %v3110_v56 = vld [vmem:[#allocation2 + $0x38] ss:$12 sps:$4 sm:$0xff]   ;;  %v4292_v14 = vrot.slane %v1546_v47, %v4281_v51 }
 0x188   : > { %v3123_v44 = vpop.eup %3122 }
 0x189   : > { %v830_v40 = vmul.f32 0.001953125, %v814_v46  ;;  %v831_v60 = vmul.f32 0.001953125, %v815_v31 }
 0x18a   : > { %v706_v26 = vpop.xlane.xlu0 %705  ;;  %v709_v21 = vpop.xlane.xlu1 %708 }
 0x18b   : > { %v846_v25 = vadd.f32 1e-05, %v830_v40  ;;  %v847_v13 = vadd.f32 1e-05, %v831_v60 }
 0x18d   : > { %3128 = vrsqrt.f32 %v846_v25 }
 0x18e   : > { %v786_v2 = vpop.xlane.xlu0 %785  ;;  %v789_v35 = vpop.xlane.xlu1 %788  ;;  %3130 = vrsqrt.f32 %v847_v13 }
 0x18f   : > { %v816_v3 = vadd.f32 %v786_v2, %v706_v26  ;;  %v817_v62 = vadd.f32 %v789_v35, %v709_v21  ;;  %v3111_v2 = vld [vmem:[#allocation2 + $0x50] ss:$12 sps:$4 sm:$0xff]   ;;  %v3125_v9 = vpop.eup %3124 }
 0x191   : > { %v833_v38 = vmul.f32 0.001953125, %v817_v62 }
 0x192   : > { %v4271_v1 = vpop.xlane.xlu0 %711  ;;  %v4274_v19 = vpop.xlane.xlu1 %714 }
 0x193   : > { %v849_v52 = vadd.f32 1e-05, %v833_v38 }
 0x196   : > { %v792_v28 = vpop.xlane.xlu0 %791  ;;  %v4283_v32 = vpop.xlane.xlu1 %794 }
 0x197   : > { %v819_v31 = vadd.f32 %v4283_v32, %v4274_v19  ;;  %v3113_v32 = vld [vmem:[#allocation2 + $0x80] ss:$12 sps:$4 sm:$0xff]  }
 0x19a   : > { %v4294_v37 = vpop.xlane.xlu0 %717  ;;  %v4300_v21 = vpop.xlane.xlu1 %720 }
 0x19e   : > { %v798_v46 = vpop.xlane.xlu0 %797 }
 0x1ee   : > { %v1435_v4 = vpop.f32.mrb[0].mxu0 }
 0x1ef   : > { %v1514_v63 = vmul.f32 %v4269_v7, %v1435_v4  ;;  %v1437_v17 = vpop.f32.mrb[1].mxu0  ;;  %v3127_v4 = vpop.eup %3126 }
 0x1f0   : > { %v1439_v5 = vpop.f32.mrb[2].mxu0  ;;  %v1515_v15 = vmul.f32 %v4269_v7, %v1437_v17  ;;  %v818_v7 = vadd.f32 %v792_v28, %v4271_v1  ;;  %v801_v28 = vpop.xlane.xlu1 %800 }
 0x1f1   : > { %v1558_v20 = vadd.f32 %v4267_v42, %v1514_v63  ;;  %v1516_v24 = vmul.f32 %v3119_v29, %v1439_v5  ;;  %v1441_v59 = vpop.f32.mrb[3].mxu0 }
 0x1f2   : > { %v1517_v45 = vmul.f32 %v3119_v29, %v1441_v59  ;;  %v1559_v5 = vadd.f32 %v4292_v14, %v1515_v15  ;;  %v821_v15 = vadd.f32 %v801_v28, %v4300_v21  ;;  %v3115_v21 = vld [vmem:[#allocation2 + $0xb0] ss:$12 sps:$4 sm:$0xff]  }
 0x1f3   : > { %v1560_v33 = vadd.f32 %v4267_v42, %v1516_v24  ;;  %1686 = vadd.xlane.f32.xlu0 %v1558_v20  ;;  %v1734_v6 = vmul.f32 %v1558_v20, %v1558_v20 }
 0x1f4   : > { %v1561_v23 = vadd.f32 %v4292_v14, %v1517_v45  ;;  %v2787_v60 = vmul.f32 -1.442695, %v1559_v5  ;;  %v727_v13 = vpop.xlane.xlu1 %726 }
 0x1f5   : > { %1688 = vadd.xlane.f32.xlu1 %v1560_v33  ;;  %v4278_v12 = vpack.c.bf16 %v1560_v33, %v1558_v20  ;;  %v1735_v49 = vmul.f32 %v1560_v33, %v1560_v33 }
 0x1f6   : > { %v1445_v34 = vpop.f32.mrb[4].mxu0  ;;  %v2788_v1 = vmul.f32 -1.442695, %v1561_v23 }
 0x1f7   : > { %v1518_v57 = vmul.f32 %v3121_v55, %v1445_v34  ;;  %v1447_v43 = vpop.f32.mrb[5].mxu0  ;;  %2080 = vmatmul.mubr.bf16.vlgmr.msra.gmra.mrb[0].mxu1 %v4278_v12  ;;  %1750 = vadd.xlane.f32.xlu0 %v1734_v6 }
 0x1f8   : > { %v4286_v41 = vmul.f32 %v3121_v55, %v1447_v43  ;;  %v1449_v48 = vpop.f32.mrb[6].mxu0  ;;  %2089 = vmatprep.mubr.bf16.mxu1 %v3407_v58  ;;  %2868 = vmatpush3.bf16.msra.mxu1 %v4254_v22  ;;  %v832_v22 = vmul.f32 0.001953125, %v816_v3  ;;  %v835_v43 = vmul.f32 0.001953125, %v819_v31 }
 0x1f9   : > { %v1562_v50 = vadd.f32 %v4267_v42, %v1518_v57  ;;  %v1520_v53 = vmul.f32 %v3123_v44, %v1449_v48  ;;  %1752 = vadd.xlane.f32.xlu1 %v1735_v49  ;;  %v1451_v54 = vpop.f32.mrb[7].mxu0  ;;  %2869 = vmatprep.subr.bf16.mxu1 %v3109_v18  ;;  %v3129_v57 = vpop.eup %3128 }
 0x1fa   : > { %v1521_v10 = vmul.f32 %v3123_v44, %v1451_v54  ;;  %v848_v63 = vadd.f32 1e-05, %v832_v22  ;;  %v724_v44 = vpop.xlane.xlu0 %723  ;;  %v3131_v62 = vpop.eup %3130  ;;  %v3114_v22 = vld [vmem:[#allocation2 + $0x98] ss:$12 sps:$4 sm:$0xff]   ;;  %v851_v38 = vadd.f32 1e-05, %v835_v43 }
 0x1fb   : > { %v1564_v39 = vadd.f32 %v4267_v42, %v1520_v53  ;;  %1690 = vadd.xlane.f32.xlu0 %v1562_v50  ;;  %v1736_v16 = vmul.f32 %v1562_v50, %v1562_v50  ;;  %v820_v53 = vadd.f32 %v798_v46, %v4294_v37 }
 0x1fc   : > { %v4298_v26 = vadd.f32 %v4292_v14, %v1521_v10  ;;  %2870 = vmatpush3.bf16.msra.mxu1 %v3109_v18  ;;  %3132 = vrsqrt.f32 %v848_v63  ;;  %v834_v18 = vmul.f32 0.001953125, %v818_v7 }
 0x1fd   : > { %1692 = vadd.xlane.f32.xlu1 %v1564_v39  ;;  %v4303_v8 = vpack.c.bf16 %v1564_v39, %v1562_v50  ;;  %2871 = vmatprep.subr.bf16.mxu1 %v3110_v56  ;;  %v1737_v61 = vmul.f32 %v1564_v39, %v1564_v39  ;;  %3134 = vrsqrt.f32 %v849_v52 }
 0x1fe   : > { %v1455_v47 = vpop.f32.mrb[8].mxu0  ;;  %3136 = vpow2.f32 %v2788_v1  ;;  %v850_v50 = vadd.f32 1e-05, %v834_v18 }
 0x1ff   : > { %v1522_v35 = vmul.f32 %v3125_v9, %v1455_v47  ;;  %v1457_v27 = vpop.f32.mrb[9].mxu0  ;;  %2090 = vmatmul.mubr.bf16.gmra.mrb[4].mxu1 %v4303_v8  ;;  %1754 = vadd.xlane.f32.xlu0 %v1736_v16  ;;  %3138 = vpow2.f32 %v2787_v60  ;;  %v804_v47 = vpop.xlane.xlu0 %803 }
 0x200   : > { %v1523_v17 = vmul.f32 %v3125_v9, %v1457_v27  ;;  %v1459_v29 = vpop.f32.mrb[10].mxu0  ;;  %2099 = vmatprep.mubr.bf16.mxu1 %v3407_v58  ;;  %2872 = vmatpush3.bf16.msra.mxu1 %v3110_v56  ;;  %3140 = vrsqrt.f32 %v850_v50  ;;  %v836_v9 = vmul.f32 0.001953125, %v820_v53 }
 0x201   : > { %v1566_v20 = vadd.f32 %v4267_v42, %v1522_v35  ;;  %v1524_v24 = vmul.f32 %v3127_v4, %v1459_v29  ;;  %1756 = vadd.xlane.f32.xlu1 %v1737_v61  ;;  %v1461_v59 = vpop.f32.mrb[11].mxu0  ;;  %2873 = vmatprep.subr.bf16.mxu1 %v3111_v2  ;;  %3142 = vrsqrt.f32 %v851_v38 }
 0x202   : > { %v4314_v33 = vadd.f32 %v4292_v14, %v1523_v17  ;;  %v1525_v40 = vmul.f32 %v3127_v4, %v1461_v59  ;;  %v837_v4 = vmul.f32 0.001953125, %v821_v15  ;;  %v807_v17 = vpop.xlane.xlu1 %806 }
 0x203   : > { %v1568_v6 = vadd.f32 %v4267_v42, %v1524_v24  ;;  %1694 = vadd.xlane.f32.xlu0 %v1566_v20  ;;  %v1738_v19 = vmul.f32 %v1566_v20, %v1566_v20  ;;  %v822_v24 = vadd.f32 %v804_v47, %v724_v44  ;;  %v823_v28 = vadd.f32 %v807_v17, %v727_v13 }
 0x204   : > { %v4318_v55 = vadd.f32 %v4292_v14, %v1525_v40  ;;  %2874 = vmatpush3.bf16.msra.mxu1 %v3111_v2  ;;  %v853_v40 = vadd.f32 1e-05, %v837_v4 }
 0x205   : > { %1696 = vadd.xlane.f32.xlu1 %v1568_v6  ;;  %v4320_v34 = vpack.c.bf16 %v1568_v6, %v1566_v20  ;;  %2875 = vmatprep.subr.bf16.mxu1 %v3112_v30  ;;  %v1739_v48 = vmul.f32 %v1568_v6, %v1568_v6  ;;  %v852_v20 = vadd.f32 1e-05, %v836_v9  ;;  %v838_v43 = vmul.f32 0.001953125, %v822_v24 }
 0x206   : > { %v1465_v49 = vpop.f32.mrb[12].mxu0  ;;  %v3133_v61 = vpop.eup %3132 }
 0x207   : > { %v1526_v25 = vmul.f32 %v3129_v57, %v1465_v49  ;;  %v1467_v3 = vpop.f32.mrb[13].mxu0  ;;  %2100 = vmatmul.mubr.bf16.gmra.mrb[8].mxu1 %v4320_v34  ;;  %1758 = vadd.xlane.f32.xlu0 %v1738_v19  ;;  %v3135_v7 = vpop.eup %3134  ;;  %3144 = vrsqrt.f32 %v852_v20 }
 0x208   : > { %v1527_v54 = vmul.f32 %v3129_v57, %v1467_v3  ;;  %v1469_v56 = vpop.f32.mrb[14].mxu0  ;;  %2109 = vmatprep.mubr.bf16.mxu1 %v3407_v58  ;;  %2876 = vmatpush3.bf16.msra.mxu1 %v3112_v30  ;;  %v3137_v5 = vpop.eup %3136  ;;  %3146 = vrsqrt.f32 %v853_v40  ;;  %v839_v3 = vmul.f32 0.001953125, %v823_v28 }
 0x209   : > { %v1570_v45 = vadd.f32 %v4267_v42, %v1526_v25  ;;  %v1528_v10 = vmul.f32 %v3131_v62, %v1469_v56  ;;  %1760 = vadd.xlane.f32.xlu1 %v1739_v48  ;;  %v1471_v39 = vpop.f32.mrb[15].mxu0  ;;  %2877 = vmatprep.subr.bf16.mxu1 %v3113_v32  ;;  %v3139_v60 = vpop.eup %3138  ;;  %v1639_v19 = vadd.f32 1.0, %v3137_v5  ;;  %v854_v56 = vadd.f32 1e-05, %v838_v43 }
 0x20a   : > { %v4328_v16 = vadd.f32 %v4292_v14, %v1527_v54  ;;  %v1529_v37 = vmul.f32 %v3131_v62, %v1471_v39  ;;  %v3141_v25 = vpop.eup %3140  ;;  %v1638_v48 = vadd.f32 1.0, %v3139_v60 }
 0x20b   : > { %v1572_v2 = vadd.f32 %v4267_v42, %v1528_v10  ;;  %1698 = vadd.xlane.f32.xlu0 %v1570_v45  ;;  %v1740_v27 = vmul.f32 %v1570_v45, %v1570_v45  ;;  %3148 = vrcp.f32 %v1639_v19  ;;  %v3143_v54 = vpop.eup %3142 }
 0x20c   : > { %v4332_v23 = vadd.f32 %v4292_v14, %v1529_v37  ;;  %2878 = vmatpush3.bf16.msra.mxu1 %v3113_v32  ;;  %3150 = vrcp.f32 %v1638_v48 }
 0x20d   : > { %1700 = vadd.xlane.f32.xlu1 %v1572_v2  ;;  %v4334_v35 = vpack.c.bf16 %v1572_v2, %v1570_v45  ;;  %2879 = vmatprep.subr.bf16.mxu1 %v3114_v22  ;;  %v1741_v46 = vmul.f32 %v1572_v2, %v1572_v2  ;;  %3152 = vrsqrt.f32 %v854_v56 }
 0x20e   : > { %v1475_v63 = vpop.f32.mrb[16].mxu0 }
 0x20f   : > { %v1530_v29 = vmul.f32 %v3133_v61, %v1475_v63  ;;  %v1477_v52 = vpop.f32.mrb[17].mxu0  ;;  %2110 = vmatmul.mubr.bf16.gmra.mrb[12].mxu1 %v4334_v35  ;;  %1762 = vadd.xlane.f32.xlu0 %v1740_v27 }
 0x210   : > { %v1531_v59 = vmul.f32 %v3133_v61, %v1477_v52  ;;  %v1479_v30 = vpop.f32.mrb[18].mxu0  ;;  %2119 = vmatprep.mubr.bf16.mxu1 %v3407_v58  ;;  %2880 = vmatpush3.bf16.msra.mxu1 %v3114_v22  ;;  %v855_v22 = vadd.f32 1e-05, %v839_v3 }
 0x211   : > { %v1532_v31 = vmul.f32 %v3135_v7, %v1479_v30  ;;  %1764 = vadd.xlane.f32.xlu1 %v1741_v46  ;;  %v1481_v1 = vpop.f32.mrb[19].mxu0  ;;  %2881 = vmatprep.subr.bf16.mxu1 %v3115_v21  ;;  %v4342_v32 = vadd.f32 %v4267_v42, %v1530_v29  ;;  %v3145_v27 = vpop.eup %3144 }
 0x212   : > { %v4339_v6 = vadd.f32 %v4292_v14, %v1531_v59  ;;  %v1533_v18 = vmul.f32 %v3135_v7, %v1481_v1  ;;  %3154 = vrsqrt.f32 %v855_v22  ;;  %v3147_v63 = vpop.eup %3146 }
 0x213   : > { %v4345_v57 = vadd.f32 %v4267_v42, %v1532_v31 }
 0x214   : > { %v4348_v49 = vadd.f32 %v4292_v14, %v1533_v18  ;;  %2882 = vmatpush3.bf16.msra.mxu1 %v3115_v21 }
 0x215   : > { %v4352_v44 = vpack.c.bf16 %v4345_v57, %v4342_v32  ;;  %v3149_v29 = vpop.eup %3148 }
 0x216   : > { %v1485_v62 = vpop.f32.mrb[20].mxu0  ;;  %v3151_v30 = vpop.eup %3150 }
 0x217   : > { %v1534_v50 = vmul.f32 %v3141_v25, %v1485_v62  ;;  %v1487_v53 = vpop.f32.mrb[21].mxu0  ;;  %2120 = vmatmul.mubr.bf16.gmra.mrb[16].mxu1 %v4352_v44  ;;  %v3153_v40 = vpop.eup %3152 }
 0x218   : > { %v1535_v13 = vmul.f32 %v3141_v25, %v1487_v53  ;;  %v1489_v45 = vpop.f32.mrb[22].mxu0  ;;  %2129 = vmatprep.mubr.bf16.mxu1 %v3407_v58 }
 0x219   : > { %v1536_v10 = vmul.f32 %v3143_v54, %v1489_v45  ;;  %v1491_v39 = vpop.f32.mrb[23].mxu0  ;;  %v1578_v37 = vadd.f32 %v4267_v42, %v1534_v50 }
 0x21a   : > { %v4357_v38 = vadd.f32 %v4292_v14, %v1535_v13  ;;  %v1537_v15 = vmul.f32 %v3143_v54, %v1491_v39 }
 0x21b   : > { %v4361_v2 = vadd.f32 %v4267_v42, %v1536_v10 }
 0x21c   : > { %5034 = vst [vmem:[#allocation8_spill] sm:$0xff] %v4357_v38  ;;  %v4364_v9 = vadd.f32 %v4292_v14, %v1537_v15  ;;  %v3155_v19 = vpop.eup %3154 }
 0x21d   : > { %v1867_v47 = vpack.c.bf16 %v4361_v2, %v1578_v37 }
 0x21e   : > { %v1495_v21 = vpop.f32.mrb[24].mxu0 }
 0x21f   : > { %v1538_v61 = vmul.f32 %v3145_v27, %v1495_v21  ;;  %v1497_v4 = vpop.f32.mrb[25].mxu0  ;;  %2130 = vmatmul.mubr.bf16.gmra.mrb[20].mxu1 %v1867_v47 }
 0x220   : > { %v1539_v7 = vmul.f32 %v3145_v27, %v1497_v4  ;;  %v1499_v17 = vpop.f32.mrb[26].mxu0  ;;  %2139 = vmatprep.mubr.bf16.mxu1 %v3407_v58  ;;  %v2790_v27 = vmul.f32 -1.442695, %v4298_v26 }
 0x221   : > { %v1540_v52 = vmul.f32 %v3147_v63, %v1499_v17  ;;  %v1501_v46 = vpop.f32.mrb[27].mxu0  ;;  %v1582_v24 = vadd.f32 %v4267_v42, %v1538_v61 }
 0x222   : > { %v4369_v5 = vadd.f32 %v4292_v14, %v1539_v7  ;;  %v1541_v20 = vmul.f32 %v3147_v63, %v1501_v46  ;;  %2468 = vperm.xlu1 %2987, %v3149_v29   ;;  %v1743_v7 = vmul.f32 %v4345_v57, %v4345_v57 }
 0x223   : > { %v4373_v59 = vadd.f32 %v4267_v42, %v1540_v52 }
 0x224   : > { %5035 = vst [vmem:[#allocation9_spill] sm:$0xff] %v4369_v5  ;;  %v1585_v31 = vadd.f32 %v4292_v14, %v1541_v20 }
 0x225   : > { %2463 = vperm.xlu0 %2986, %v3151_v30   ;;  %v1868_v1 = vpack.c.bf16 %v4373_v59, %v1582_v24 }
 0x226   : > { %v1505_v28 = vpop.f32.mrb[28].mxu0 }
 0x227   : > { %v1542_v18 = vmul.f32 %v3153_v40, %v1505_v28  ;;  %v1507_v60 = vpop.f32.mrb[29].mxu0  ;;  %2140 = vmatmul.mubr.bf16.gmra.mrb[24].mxu1 %v1868_v1 }
 0x228   : > { %v1543_v43 = vmul.f32 %v3153_v40, %v1507_v60  ;;  %v1509_v25 = vpop.f32.mrb[30].mxu0  ;;  %2149 = vmatprep.mubr.bf16.mxu1 %v3407_v58  ;;  %v1563_v58 = vadd.f32 %v4292_v14, %v4286_v41 }
 0x229   : > { %v1544_v3 = vmul.f32 %v3155_v19, %v1509_v25  ;;  %v1511_v48 = vpop.f32.mrb[31].mxu0  ;;  %v1586_v53 = vadd.f32 %v4267_v42, %v1542_v18 }
 0x22a   : > { %v4379_v62 = vadd.f32 %v4292_v14, %v1543_v43  ;;  %v1545_v50 = vmul.f32 %v3155_v19, %v1511_v48  ;;  %v2789_v45 = vmul.f32 -1.442695, %v1563_v58 }
 0x22b   : > { %v4383_v54 = vadd.f32 %v4267_v42, %v1544_v3  ;;  %v1748_v10 = vmul.f32 %v1586_v53, %v1586_v53 }
 0x22c   : > { %5036 = vst [vmem:[#allocation15_spill] sm:$0xff] %v4379_v62  ;;  %v1589_v56 = vadd.f32 %v4292_v14, %v1545_v50  ;;  %3156 = vpow2.f32 %v2789_v45  ;;  %v1744_v14 = vmul.f32 %v1578_v37, %v1578_v37  ;;  %v2793_v62 = vmul.f32 -1.442695, %v4328_v16 }
 0x22d   : > { %5037 = vst [vmem:[#allocation14_spill] sm:$0xff] %v4383_v54  ;;  %v1869_v13 = vpack.c.bf16 %v4383_v54, %v1586_v53 }
 0x22e   : > { %v2802_v39 = vmul.f32 -1.442695, %v1589_v56 }
 0x22f   : > { %2150 = vmatmul.mubr.bf16.gmra.mrb[28].mxu1 %v1869_v13 }
 0x230   : > { %2883 = vmatprep.mubr.bf16.mxu1 %v4278_v12  ;;  %v1742_v12 = vmul.f32 %v4342_v32, %v4342_v32 }
 0x236   : > { %v3157_v42 = vpop.eup %3156 }
 0x237   : > { %2884 = vmatmul.mubr.bf16.vlgmr.msra.gmra.mrb[32].mxu1 %v4303_v8  ;;  %v1640_v41 = vadd.f32 1.0, %v3157_v42 }
 0x238   : > { %2887 = vmatprep.mubr.bf16.mxu1 %v4320_v34  ;;  %v2796_v34 = vmul.f32 -1.442695, %v4348_v49 }
 0x239   : > { %3158 = vrcp.f32 %v1640_v41 }
 0x23a   : > { %3160 = vpow2.f32 %v2796_v34 }
 0x23f   : > { %2888 = vmatmul.mubr.bf16.gmra.mrb[36].mxu1 %v4334_v35  ;;  %v1746_v35 = vmul.f32 %v1582_v24, %v1582_v24 }
 0x240   : > { %2891 = vmatprep.mubr.bf16.mxu1 %v4352_v44  ;;  %v2798_v44 = vmul.f32 -1.442695, %v4364_v9 }
 0x242   : > { %3162 = vpow2.f32 %v2798_v44 }
 0x243   : > { %v3159_v8 = vpop.eup %3158 }
 0x244   : > { %1702 = vadd.xlane.f32.xlu0 %v4342_v32  ;;  %v2800_v32 = vmul.f32 -1.442695, %v1585_v31  ;;  %v3161_v22 = vpop.eup %3160 }
 0x245   : > { %v1647_v15 = vadd.f32 1.0, %v3161_v22 }
 0x246   : > { %1704 = vadd.xlane.f32.xlu1 %v4345_v57  ;;  %3164 = vpow2.f32 %v2800_v32 }
 0x247   : > { %2892 = vmatmul.mubr.bf16.gmra.mrb[40].mxu1 %v1867_v47  ;;  %3166 = vpow2.f32 %v2802_v39 }
 0x248   : > { %1766 = vadd.xlane.f32.xlu0 %v1742_v12  ;;  %2895 = vmatprep.mubr.bf16.mxu1 %v1868_v1  ;;  %3168 = vrcp.f32 %v1647_v15 }
 0x24c   : > { %1706 = vadd.xlane.f32.xlu0 %v1578_v37  ;;  %v3163_v37 = vpop.eup %3162 }
 0x24d   : > { %v1649_v47 = vadd.f32 1.0, %v3163_v37 }
 0x24f   : > { %2896 = vmatmul.mubr.bf16.gmra.mrb[44].mxu1 %v1869_v13  ;;  %3170 = vrcp.f32 %v1649_v47 }
 0x250   : > { %1770 = vadd.xlane.f32.xlu0 %v1744_v14  ;;  %v3165_v49 = vpop.eup %3164  ;;  %3172 = vpow2.f32 %v2790_v27 }
 0x251   : > { %v1651_v21 = vadd.f32 1.0, %v3165_v49  ;;  %v3167_v61 = vpop.eup %3166  ;;  %v2791_v49 = vmul.f32 -1.442695, %v4314_v33 }
 0x252   : > { %v1653_v9 = vadd.f32 1.0, %v3167_v61  ;;  %v3169_v4 = vpop.eup %3168 }
 0x253   : > { %3174 = vrcp.f32 %v1651_v21 }
 0x254   : > { %1710 = vadd.xlane.f32.xlu0 %v1582_v24  ;;  %3176 = vrcp.f32 %v1653_v9 }
 0x257   : > { %2473 = vperm.xlu1 %2987, %v3159_v8  }
 0x258   : > { %1774 = vadd.xlane.f32.xlu0 %v1746_v35 }
 0x259   : > { %v3171_v63 = vpop.eup %3170 }
 0x25a   : > { %v3173_v17 = vpop.eup %3172 }
 0x25b   : > { %v1641_v52 = vadd.f32 1.0, %v3173_v17 }
 0x25c   : > { %1714 = vadd.xlane.f32.xlu0 %v1586_v53 }
 0x25d   : > { %v3175_v29 = vpop.eup %3174  ;;  %3178 = vrcp.f32 %v1641_v52 }
 0x25e   : > { %v3177_v46 = vpop.eup %3176  ;;  %3180 = vpow2.f32 %v2791_v49 }
 0x260   : > { %1778 = vadd.xlane.f32.xlu0 %v1748_v10 }
 0x267   : > { %v3179_v48 = vpop.eup %3178 }
 0x268   : > { %v3181_v27 = vpop.eup %3180 }
 0x269   : > { %v1642_v21 = vadd.f32 1.0, %v3181_v27  ;;  %v2792_v27 = vmul.f32 -1.442695, %v4318_v55 }
 0x26b   : > { %3182 = vrcp.f32 %v1642_v21 }
 0x26c   : > { %3184 = vpow2.f32 %v2792_v27 }
 0x275   : > { %v3183_v61 = vpop.eup %3182 }
 0x276   : > { %2508 = vperm.xlu0 %2986, %v3169_v4  }
 0x27a   : > { %2518 = vperm.xlu0 %2986, %v3171_v63   ;;  %v4472_v63 = vld [vmem:[%s4957_s6] sm:$0x7] }
 0x27b   : > { %1768 = vadd.xlane.f32.xlu1 %v1743_v7  ;;  %v4475_v7 = vand.u32 127, %v1548_v36  ;;  %v4479_v33 = vrot.slane %v4472_v63, %v4281_v51  ;;  %v4535_v27 = vrot.slane %v4472_v63, %v4261_v0 }
 0x27d   : > { %vm2460_vm0 = vcmp.eq.s32.totalorder %v4475_v7, 4 }
 0x27e   : > { %2528 = vperm.xlu0 %2986, %v3175_v29  }
 0x280   : > { %v1687_v26 = vpop.xlane.xlu0 %1686 }
 0x281   : > { %v4403_v20 = vmul.f32 0.0078125, %v1687_v26 }
 0x282   : > { %v1689_v24 = vpop.xlane.xlu1 %1688  ;;  %2538 = vperm.xlu0 %2986, %v3177_v46  }
 0x283   : > { %v4405_v30 = vmul.f32 0.0078125, %v1689_v24  ;;  %v4409_v1 = vmul.f32 %v4403_v20, %v4403_v20 }
 0x284   : > { %v1751_v31 = vpop.xlane.xlu0 %1750 }
 0x285   : > { %v4411_v57 = vmul.f32 0.0078125, %v1751_v31  ;;  %v4415_v28 = vmul.f32 %v4405_v30, %v4405_v30 }
 0x286   : > { %v1753_v40 = vpop.xlane.xlu1 %1752 }
 0x287   : > { %v4419_v60 = vmul.f32 0.0078125, %v1753_v40 }
 0x288   : > { %v1691_v19 = vpop.xlane.xlu0 %1690 }
 0x289   : > { %v4423_v25 = vmul.f32 0.0078125, %v1691_v19 }
 0x28a   : > { %v1693_v3 = vpop.xlane.xlu1 %1692 }
 0x28b   : > { %v4425_v50 = vmul.f32 0.0078125, %v1693_v3  ;;  %v4429_v56 = vmul.f32 %v4423_v25, %v4423_v25 }
 0x28c   : > { %2478 = vperm.xlu1 %2987, %v3179_v48   ;;  %v1755_v53 = vpop.xlane.xlu0 %1754 }
 0x28d   : > { %v4431_v13 = vmul.f32 0.0078125, %v1755_v53  ;;  %v4435_v45 = vmul.f32 %v4425_v50, %v4425_v50 }
 0x28e   : > { %v1757_v58 = vpop.xlane.xlu1 %1756 }
 0x28f   : > { %v4439_v12 = vmul.f32 0.0078125, %v1757_v58 }
 0x290   : > { %v1695_v41 = vpop.xlane.xlu0 %1694 }
 0x291   : > { %v4443_v8 = vmul.f32 0.0078125, %v1695_v41 }
 0x292   : > { %v1697_v34 = vpop.xlane.xlu1 %1696 }
 0x293   : > { %v4445_v35 = vmul.f32 0.0078125, %v1697_v34  ;;  %v4449_v32 = vmul.f32 %v4443_v8, %v4443_v8 }
 0x294   : > { %v1759_v44 = vpop.xlane.xlu0 %1758 }
 0x295   : > { %v4451_v10 = vmul.f32 0.0078125, %v1759_v44  ;;  %v4455_v22 = vmul.f32 %v4445_v35, %v4445_v35 }
 0x296   : > { %v1761_v39 = vpop.xlane.xlu1 %1760 }
 0x297   : > { %v4459_v37 = vmul.f32 0.0078125, %v1761_v39 }
 0x298   : > { %v4465_v9 = vpop.xlane.xlu0 %1698 }
 0x299   : > { %v4564_v16 = vmul.f32 0.0078125, %v4465_v9 }
 0x29a   : > { %v4467_v4 = vpop.xlane.xlu1 %1700 }
 0x29c   : > { %v4481_v17 = vpop.xlane.xlu0 %1762 }
 0x29e   : > { %v4483_v29 = vpop.xlane.xlu1 %1764 }
 0x2a2   : > { %v2469_v3 = vpop.permute.xlu1 %2468 }
 0x2a4   : > { %v2464_v24 = vpop.permute.xlu0 %2463 }
 0x2b0   : > { %1708 = vadd.xlane.f32.xlu1 %v4361_v2 }
 0x2c1   : > { %2483 = vperm.xlu1 %2987, %v3183_v61  }
 0x2ca   : > { %v2081_v52 = vpop.f32.mrb[0].mxu1 }
 0x2cb   : > { %v2083_v26 = vpop.f32.mrb[1].mxu1  ;;  %v2082_v18 = vadd.f32 %v2081_v52, %v4535_v27  ;;  %v5040_v52 = vsub.f32 %v4419_v60, %v4415_v28  ;;  %v1788_v28 = vmul.f32 0.0078125, %v4481_v17 }
 0x2cc   : > { %v2084_v36 = vadd.f32 %v2083_v26, %v4479_v33  ;;  %v2085_v46 = vpop.f32.mrb[2].mxu1 }
 0x2cd   : > { %v2087_v31 = vpop.f32.mrb[3].mxu1  ;;  %v2086_v38 = vadd.f32 %v2085_v46, %v4535_v27 }
 0x2ce   : > { %v2541_v40 = vsel %vm2460_vm0, %v2464_v24, %v2084_v36  ;;  %v2088_v19 = vadd.f32 %v2087_v31, %v4479_v33 }
 0x2cf   : > { %2558 = vst.msk [vmem:[%s4490_s22] sm:$0xff] %vm2557_vm1, %v2541_v40  ;;  %v2828_v60 = vmul.f32 -1.442695, %v2086_v38 }
 0x2d0   : > { %v2542_v48 = vsel %vm2460_vm0, %v2469_v3, %v2088_v19 }
 0x2d1   : > { %2559 = vst.msk [vmem:[%s4490_s22 + $0x8] sm:$0xff] %vm2557_vm1, %v2542_v48  ;;  %v4502_v53 = vpop.xlane.xlu0 %1702 }
 0x2d2   : > { %v2091_v58 = vpop.f32.mrb[4].mxu1 }
 0x2d3   : > { %v4504_v41 = vpop.xlane.xlu1 %1704  ;;  %v2093_v34 = vpop.f32.mrb[5].mxu1 }
 0x2d4   : > { %v2095_v44 = vpop.f32.mrb[6].mxu1  ;;  %v2094_v21 = vadd.f32 %v2093_v34, %v4479_v33 }
 0x2d5   : > { %v2097_v39 = vpop.f32.mrb[7].mxu1  ;;  %v4506_v49 = vpop.xlane.xlu0 %1766 }
 0x2d6   : > { %v4511_v61 = vadd.f32 %v2097_v39, %v4479_v33 }
 0x2d7   : > { %v2474_v26 = vpop.permute.xlu1 %2473 }
 0x2d8   : > { %v2543_v36 = vsel %vm2460_vm0, %v2474_v26, %v2094_v21 }
 0x2d9   : > { %2560 = vst.msk [vmem:[%s4490_s22 + $0x10] sm:$0xff] %vm2557_vm1, %v2543_v36  ;;  %v4517_v24 = vpop.xlane.xlu0 %1706  ;;  %v1745_v36 = vmul.f32 %v4361_v2, %v4361_v2  ;;  %v5039_v2 = vsub.f32 %v4411_v57, %v4409_v1  ;;  %v5041_v57 = vsub.f32 %v4431_v13, %v4429_v56  ;;  %v1789_v56 = vmul.f32 0.0078125, %v4483_v29 }
 0x2da   : > { %v2101_v31 = vpop.f32.mrb[8].mxu1 }
 0x2db   : > { %v2103_v40 = vpop.f32.mrb[9].mxu1  ;;  %v1830_v5 = vadd.f32 1e-05, %v5039_v2  ;;  %v2096_v2 = vadd.f32 %v2095_v44, %v4535_v27  ;;  %v4593_v44 = vmul.f32 0.0078125, %v4502_v53  ;;  %v1790_v53 = vmul.f32 0.0078125, %v4506_v49 }
 0x2dc   : > { %v4519_v19 = vpop.f32.mrb[10].mxu1  ;;  %v4522_v55 = vadd.f32 %v2103_v40, %v4479_v33  ;;  %v3185_v40 = vpop.eup %3184 }
 0x2dd   : > { %v2107_v3 = vpop.f32.mrb[11].mxu1  ;;  %v4524_v48 = vpop.xlane.xlu0 %1770  ;;  %v1643_v43 = vadd.f32 1.0, %v3185_v40  ;;  %v1831_v40 = vadd.f32 1e-05, %v5040_v52  ;;  %v2830_v29 = vmul.f32 -1.442695, %v2096_v2  ;;  %v1806_v49 = vmul.f32 %v4593_v44, %v4593_v44 }
 0x2de   : > { %v4527_v34 = vadd.f32 %v2107_v3, %v4479_v33 }
 0x2df   : > { %3186 = vrcp.f32 %v1643_v43  ;;  %v1832_v43 = vadd.f32 1e-05, %v5041_v57 }
 0x2e0   : > { %3188 = vpow2.f32 %v2793_v62  ;;  %v1804_v62 = vmul.f32 %v4564_v16, %v4564_v16 }
 0x2e1   : > { %v4529_v39 = vpop.xlane.xlu0 %1710  ;;  %3190 = vrsqrt.f32 %v1830_v5  ;;  %v5042_v5 = vsub.f32 %v4439_v12, %v4435_v45  ;;  %v5043_v45 = vsub.f32 %v4451_v10, %v4449_v32  ;;  %v5044_v32 = vsub.f32 %v4459_v37, %v4455_v22 }
 0x2e2   : > { %v4531_v21 = vpop.f32.mrb[12].mxu1 }
 0x2e3   : > { %v2113_v26 = vpop.f32.mrb[13].mxu1  ;;  %v1833_v13 = vadd.f32 1e-05, %v5042_v5  ;;  %v1834_v12 = vadd.f32 1e-05, %v5043_v45  ;;  %v2112_v22 = vadd.f32 %v4531_v21, %v4535_v27 }
 0x2e4   : > { %v4539_v47 = vpop.f32.mrb[14].mxu1  ;;  %v4542_v15 = vadd.f32 %v2113_v26, %v4479_v33  ;;  %v1835_v10 = vadd.f32 1e-05, %v5044_v32 }
 0x2e5   : > { %1772 = vadd.xlane.f32.xlu1 %v1745_v36  ;;  %v2117_v3 = vpop.f32.mrb[15].mxu1  ;;  %v4544_v14 = vpop.xlane.xlu0 %1774  ;;  %v2827_v36 = vmul.f32 -1.442695, %v2082_v18  ;;  %v2116_v21 = vadd.f32 %v4539_v47, %v4535_v27 }
 0x2e6   : > { %5038 = vst [vmem:[#allocation17_spill] sm:$0xff] %v4542_v15  ;;  %v4547_v42 = vadd.f32 %v2117_v3, %v4479_v33  ;;  %v2092_v15 = vadd.f32 %v2091_v58, %v4535_v27  ;;  %v4575_v58 = vmul.f32 0.0078125, %v4467_v4  ;;  %v2102_v4 = vadd.f32 %v2101_v31, %v4535_v27 }
 0x2e7   : > { %3192 = vpow2.f32 %v2827_v36 }
 0x2e8   : > { %v2829_v9 = vmul.f32 -1.442695, %v2092_v15  ;;  %3194 = vrsqrt.f32 %v1831_v40  ;;  %v1805_v38 = vmul.f32 %v4575_v58, %v4575_v58  ;;  %v1820_v15 = vsub.f32 %v1788_v28, %v1804_v62 }
 0x2e9   : > { %v4558_v54 = vpop.xlane.xlu0 %1714  ;;  %3196 = vrsqrt.f32 %v1832_v43  ;;  %v3187_v43 = vpop.eup %3186  ;;  %v2831_v28 = vmul.f32 -1.442695, %v2102_v4  ;;  %v2106_v62 = vadd.f32 %v4519_v19, %v4535_v27 }
 0x2ea   : > { %v4555_v26 = vpop.f32.mrb[16].mxu1  ;;  %3198 = vpow2.f32 %v2828_v60  ;;  %v1821_v31 = vsub.f32 %v1789_v56, %v1805_v38  ;;  %v4613_v5 = vpop.eup %3188 }
 0x2eb   : > { %v2123_v3 = vpop.f32.mrb[17].mxu1  ;;  %3200 = vpow2.f32 %v2829_v9  ;;  %v4624_v37 = vpop.eup %3190 }
 0x2ec   : > { %v4566_v1 = vpop.f32.mrb[18].mxu1  ;;  %v4572_v18 = vadd.f32 %v2123_v3, %v4479_v33  ;;  %3202 = vrsqrt.f32 %v1833_v13  ;;  %v4618_v13 = vmul.f32 0.0078125, %v4517_v24  ;;  %v1837_v19 = vadd.f32 1e-05, %v1821_v31 }
 0x2ed   : > { %v2127_v46 = vpop.f32.mrb[19].mxu1  ;;  %v4586_v3 = vpop.xlane.xlu0 %1778  ;;  %3204 = vpow2.f32 %v2830_v29  ;;  %v1822_v29 = vsub.f32 %v1790_v53, %v1806_v49  ;;  %v1792_v24 = vmul.f32 0.0078125, %v4524_v48  ;;  %v2833_v48 = vmul.f32 -1.442695, %v2112_v22 }
 0x2ee   : > { %v2128_v52 = vadd.f32 %v2127_v46, %v4479_v33  ;;  %v1836_v46 = vadd.f32 1e-05, %v1820_v15  ;;  %3206 = vrsqrt.f32 %v1834_v12  ;;  %v2353_v15 = vld [vmem:[%s4958_s7] sm:$0x3]  ;;  %v2832_v12 = vmul.f32 -1.442695, %v2106_v62 }
 0x2ef   : > { %3208 = vpow2.f32 %v2831_v28  ;;  %v4646_v28 = vrot.slane %v2353_v15, %v4261_v0  ;;  %v1838_v62 = vadd.f32 1e-05, %v1822_v29  ;;  %v2122_v0 = vadd.f32 %v4555_v26, %v4535_v27 }
 0x2f0   : > { %3210 = vrsqrt.f32 %v1835_v10 }
 0x2f1   : > { %v3193_v38 = vpop.eup %3192  ;;  %3212 = vrsqrt.f32 %v1836_v46 }
 0x2f2   : > { %v4590_v17 = vpop.f32.mrb[20].mxu1  ;;  %v4633_v45 = vpop.eup %3194  ;;  %3214 = vrsqrt.f32 %v1837_v19 }
 0x2f3   : > { %v2133_v36 = vpop.f32.mrb[21].mxu1  ;;  %3216 = vpow2.f32 %v2832_v12  ;;  %v2132_v29 = vadd.f32 %v4590_v17, %v4535_v27  ;;  %v1794_v12 = vmul.f32 0.0078125, %v4544_v14 }
 0x2f4   : > { %v4600_v40 = vadd.f32 %v2133_v36, %v4479_v33  ;;  %v2135_v57 = vpop.f32.mrb[22].mxu1  ;;  %3218 = vpow2.f32 %v2833_v48  ;;  %v2126_v48 = vadd.f32 %v4566_v1, %v4535_v27 }
 0x2f5   : > { %v4604_v60 = vadd.f32 %v2135_v57, %v4535_v27  ;;  %v2137_v9 = vpop.f32.mrb[23].mxu1  ;;  %v2509_v2 = vpop.permute.xlu0 %2508  ;;  %v2837_v1 = vmul.f32 -1.442695, %v2132_v29 }
 0x2f6   : > { %v2550_v56 = vsel %vm2460_vm0, %v2509_v2, %v2128_v52  ;;  %2488 = vperm.xlu1 %2987, %v3187_v43   ;;  %v2138_v4 = vadd.f32 %v2137_v9, %v4479_v33  ;;  %v4639_v57 = vpop.eup %3196  ;;  %v1808_v43 = vmul.f32 %v4618_v13, %v4618_v13  ;;  %v2305_v9 = vadd.f32 1.0, %v3193_v38 }
 0x2f7   : > { %2567 = vst.msk [vmem:[%s4490_s22 + $0x48] sm:$0xff] %vm2557_vm1, %v2550_v56  ;;  %v3199_v53 = vpop.eup %3198  ;;  %v2834_v56 = vmul.f32 -1.442695, %v2116_v21 }
 0x2f8   : > { %v3201_v10 = vpop.eup %3200  ;;  %v1824_v46 = vsub.f32 %v1792_v24, %v1808_v43  ;;  %3220 = vrcp.f32 %v2305_v9  ;;  %v4668_v43 = vrot.slane %v2353_v15, %v4281_v51  ;;  %v4684_v51 = vmul.f32 %v4646_v28, %v4405_v30 }
 0x2f9   : > { %v2519_v36 = vpop.permute.xlu0 %2518  ;;  %v4660_v38 = vpop.eup %3202  ;;  %v2307_v21 = vadd.f32 1.0, %v3201_v10  ;;  %3222 = vpow2.f32 %v2834_v56  ;;  %v1914_v10 = vsub.s32 2, %v4258_v11  ;;  %v2836_v30 = vmul.f32 -1.442695, %v2126_v48 }
 0x2fa   : > { %v2552_v31 = vsel %vm2460_vm0, %v2519_v36, %v2138_v4  ;;  %v4637_v52 = vpop.f32.mrb[24].mxu1  ;;  %v4655_v4 = vmul.f32 0.0078125, %v4529_v39  ;;  %v2306_v36 = vadd.f32 1.0, %v3199_v53  ;;  %v1840_v26 = vadd.f32 1e-05, %v1824_v46 }
 0x2fb   : > { %2569 = vst.msk [vmem:[%s4490_s22 + $0x58] sm:$0xff] %vm2557_vm1, %v2552_v31  ;;  %v2143_v47 = vpop.f32.mrb[25].mxu1  ;;  %v3205_v31 = vpop.eup %3204  ;;  %3224 = vrsqrt.f32 %v1838_v62  ;;  %v2835_v53 = vmul.f32 -1.442695, %v2122_v0 }
 0x2fc   : > { %v4649_v2 = vadd.f32 %v2143_v47, %v4479_v33  ;;  %v2145_v32 = vpop.f32.mrb[26].mxu1  ;;  %v4674_v17 = vpop.eup %3206  ;;  %v4678_v47 = vmul.f32 %v4646_v28, %v4403_v20  ;;  %v1810_v14 = vmul.f32 %v4655_v4, %v4655_v4  ;;  %3226 = vrcp.f32 %v2306_v36 }
 0x2fd   : > { %v4652_v49 = vadd.f32 %v2145_v32, %v4535_v27  ;;  %v2147_v22 = vpop.f32.mrb[27].mxu1  ;;  %v2529_v24 = vpop.permute.xlu0 %2528  ;;  %3228 = vrcp.f32 %v2307_v21  ;;  %v2308_v20 = vadd.f32 1.0, %v3205_v31  ;;  %v2142_v21 = vadd.f32 %v4637_v52, %v4535_v27 }
 0x2fe   : > { %5045 = vst [vmem:[#allocation16_spill] sm:$0xff] %v4649_v2  ;;  %v2148_v19 = vadd.f32 %v2147_v22, %v4479_v33  ;;  %v3209_v32 = vpop.eup %3208  ;;  %v1826_v62 = vsub.f32 %v1794_v12, %v1810_v14  ;;  %3230 = vrsqrt.f32 %v1840_v26  ;;  %v4710_v26 = vrot.slane %v4472_v63, %v1914_v10 }
 0x2ff   : > { %v4687_v46 = vpop.eup %3210  ;;  %3232 = vpow2.f32 %v2835_v53  ;;  %v2360_v14 = vmul.f32 %v4646_v28, %v4423_v25  ;;  %v1796_v63 = vmul.f32 0.0078125, %v4586_v3 }
 0x300   : > { %v2554_v39 = vsel %vm2460_vm0, %v2529_v24, %v2148_v19  ;;  %v4692_v0 = vpop.eup %3212  ;;  %v4695_v19 = vmul.f32 0.0078125, %v4504_v41  ;;  %v2309_v24 = vadd.f32 1.0, %v3209_v32  ;;  %3234 = vpow2.f32 %v2837_v1 }
 0x301   : > { %2571 = vst.msk [vmem:[%s4490_s22 + $0x68] sm:$0xff] %vm2557_vm1, %v2554_v39  ;;  %v4700_v29 = vpop.eup %3214  ;;  %v4706_v39 = vmul.f32 0.0078125, %v4558_v54  ;;  %v2539_v41 = vpop.permute.xlu0 %2538  ;;  %3236 = vrcp.f32 %v2308_v20  ;;  %v1842_v53 = vadd.f32 1e-05, %v1826_v62  ;;  %v2361_v32 = vmul.f32 %v4646_v28, %v4425_v50 }
 0x302   : > { %v2151_v9 = vpop.f32.mrb[28].mxu1  ;;  %v3217_v48 = vpop.eup %3216  ;;  %3238 = vpow2.f32 %v2836_v30  ;;  %v1807_v1 = vmul.f32 %v4695_v19, %v4695_v19  ;;  %v2839_v50 = vmul.f32 -1.442695, %v2142_v21 }
 0x303   : > { %v2153_v15 = vpop.f32.mrb[29].mxu1  ;;  %v2152_v31 = vadd.f32 %v2151_v9, %v4535_v27  ;;  %v3219_v54 = vpop.eup %3218  ;;  %v4729_v9 = vmul.f32 %v4646_v28, %v4445_v35  ;;  %3240 = vrcp.f32 %v2309_v24  ;;  %v1812_v10 = vmul.f32 %v4706_v39, %v4706_v39 }
 0x304   : > { %v4690_v56 = vadd.f32 %v2153_v15, %v4479_v33  ;;  %v2155_v22 = vpop.f32.mrb[30].mxu1  ;;  %v4725_v25 = vpop.eup %3220  ;;  %v2311_v35 = vadd.f32 1.0, %v3219_v54  ;;  %3242 = vrsqrt.f32 %v1842_v53 }
 0x305   : > { %v4698_v36 = vadd.f32 %v2155_v22, %v4535_v27  ;;  %v2157_v11 = vpop.f32.mrb[31].mxu1  ;;  %v4720_v27 = vmul.f32 %v4646_v28, %v4443_v8  ;;  %v3223_v8 = vpop.eup %3222  ;;  %v2841_v3 = vmul.f32 -1.442695, %v2152_v31  ;;  %3244 = vpow2.f32 %v2839_v50 }
 0x306   : > { %5046 = vst [vmem:[#allocation10_spill] sm:$0xff] %v4690_v56  ;;  %v2158_v12 = vadd.f32 %v2157_v11, %v4479_v33  ;;  %v4736_v30 = vpop.eup %3224  ;;  %v2310_v11 = vadd.f32 1.0, %v3217_v48  ;;  %v2312_v54 = vadd.f32 1.0, %v3223_v8  ;;  %v2364_v50 = vmul.f32 %v4646_v28, %v4564_v16 }
 0x307   : > { %3246 = vpow2.f32 %v2841_v3  ;;  %v2365_v3 = vmul.f32 %v4646_v28, %v4575_v58 }
 0x308   : > { %v2556_v33 = vsel %vm2460_vm0, %v2539_v41, %v2158_v12  ;;  %v1769_v52 = vpop.xlane.xlu1 %1768  ;;  %v3227_v41 = vpop.eup %3226  ;;  %3248 = vrcp.f32 %v2311_v35 }
 0x309   : > { %2573 = vst.msk [vmem:[%s4490_s22 + $0x78] sm:$0xff] %vm2557_vm1, %v2556_v33  ;;  %v1791_v20 = vmul.f32 0.0078125, %v1769_v52  ;;  %v1828_v33 = vsub.f32 %v1796_v63, %v1812_v10  ;;  %v3229_v48 = vpop.eup %3228  ;;  %3250 = vrcp.f32 %v2310_v11 }
 0x30a   : > { %v2885_v15 = vpop.f32.mrb[32].mxu1  ;;  %v4748_v2 = vpop.eup %3230  ;;  %3252 = vrcp.f32 %v2312_v54 }
 0x30b   : > { %v2203_v62 = vadd.f32 %v2885_v15, %v4710_v26  ;;  %v2194_v22 = vpop.f32.mrb[33].mxu1  ;;  %v3233_v10 = vpop.eup %3232 }
 0x30c   : > { %v2195_v24 = vadd.f32 %v2194_v22, %v4710_v26  ;;  %v2479_v21 = vpop.permute.xlu1 %2478  ;;  %v2886_v12 = vpop.f32.mrb[34].mxu1 }
 0x30d   : > { %v2376_v56 = vsub.f32 %v2203_v62, %v2360_v14  ;;  %v2544_v31 = vsel %vm2460_vm0, %v2479_v21, %v4511_v61  ;;  %v2206_v52 = vadd.f32 %v2886_v12, %v4710_v26  ;;  %v2197_v15 = vpop.f32.mrb[35].mxu1  ;;  %v1823_v14 = vsub.f32 %v1791_v20, %v1807_v1  ;;  %v3235_v62 = vpop.eup %3234 }
 0x30e   : > { %v2374_v53 = vsub.f32 %v2195_v24, %v4678_v47  ;;  %2561 = vst.msk [vmem:[%s4490_s22 + $0x18] sm:$0xff] %vm2557_vm1, %v2544_v31  ;;  %v2198_v22 = vadd.f32 %v2197_v15, %v4710_v26  ;;  %v2313_v31 = vadd.f32 1.0, %v3233_v10 }
 0x30f   : > { %v2392_v61 = vmul.f32 %v4639_v57, %v2376_v56  ;;  %v2377_v63 = vsub.f32 %v2206_v52, %v2361_v32  ;;  %v3237_v57 = vpop.eup %3236  ;;  %v1844_v56 = vadd.f32 1e-05, %v1828_v33 }
 0x310   : > { %v2390_v47 = vmul.f32 %v4624_v37, %v2374_v53  ;;  %v2375_v8 = vsub.f32 %v2198_v22, %v4684_v51  ;;  %v3239_v35 = vpop.eup %3238  ;;  %v1839_v51 = vadd.f32 1e-05, %v1823_v14 }
 0x311   : > { %v2412_v1 = vadd.f32 %v4668_v43, %v2392_v61  ;;  %v2393_v20 = vmul.f32 %v4660_v38, %v2377_v63  ;;  %v3241_v12 = vpop.eup %3240  ;;  %v2315_v38 = vadd.f32 1.0, %v3235_v62  ;;  %3254 = vrsqrt.f32 %v1844_v56 }
 0x312   : > { %v2410_v16 = vadd.f32 %v4668_v43, %v2390_v47  ;;  %v2391_v32 = vmul.f32 %v4633_v45, %v2375_v8  ;;  %v2889_v37 = vpop.f32.mrb[36].mxu1  ;;  %v4775_v14 = vpop.eup %3242  ;;  %3256 = vrsqrt.f32 %v1839_v51  ;;  %v1644_v62 = vadd.f32 1.0, %v4613_v5 }
 0x313   : > { %v2428_v24 = vmul.f32 %v3229_v48, %v2412_v1  ;;  %v2413_v21 = vadd.f32 %v4668_v43, %v2393_v20  ;;  %v2219_v58 = vadd.f32 %v2889_v37, %v4710_v26  ;;  %v2210_v11 = vpop.f32.mrb[37].mxu1  ;;  %v3245_v8 = vpop.eup %3244  ;;  %3258 = vrcp.f32 %v2315_v38 }
 0x314   : > { %v2426_v52 = vmul.f32 %v4725_v25, %v2410_v16  ;;  %v2411_v33 = vadd.f32 %v4668_v43, %v2391_v32  ;;  %v2890_v15 = vpop.f32.mrb[38].mxu1  ;;  %v2211_v54 = vadd.f32 %v2210_v11, %v4710_v26  ;;  %v2314_v25 = vadd.f32 1.0, %v3239_v35  ;;  %v3247_v20 = vpop.eup %3246 }
 0x315   : > { %2444 = vst [vmem:[%s4770_s28 + $0x10] sm:$0xff] %v2428_v24  ;;  %v2429_v45 = vmul.f32 %v3237_v57, %v2413_v21  ;;  %v2380_v48 = vsub.f32 %v2219_v58, %v2364_v50  ;;  %v2222_v53 = vadd.f32 %v2890_v15, %v4710_v26  ;;  %v2213_v22 = vpop.f32.mrb[39].mxu1  ;;  %3260 = vrcp.f32 %v2313_v31  ;;  %v3249_v16 = vpop.eup %3248 }
 0x316   : > { %2442 = vst [vmem:[%s4770_s28] sm:$0xff] %v2426_v52  ;;  %v2427_v61 = vmul.f32 %v3227_v41, %v2411_v33  ;;  %v2214_v63 = vadd.f32 %v2213_v22, %v4710_v26  ;;  %v2378_v50 = vsub.f32 %v2211_v54, %v4720_v27  ;;  %v2368_v27 = vmul.f32 %v4646_v28, %v4618_v13 }
 0x317   : > { %2445 = vst [vmem:[%s4770_s28 + $0x18] sm:$0xff] %v2429_v45  ;;  %v2396_v10 = vmul.f32 %v4692_v0, %v2380_v48  ;;  %v2381_v47 = vsub.f32 %v2222_v53, %v2365_v3  ;;  %v2366_v0 = vmul.f32 %v4646_v28, %v4593_v44  ;;  %3262 = vrcp.f32 %v2314_v25  ;;  %v3251_v3 = vpop.eup %3250 }
 0x318   : > { %2443 = vst [vmem:[%s4770_s28 + $0x8] sm:$0xff] %v2427_v61  ;;  %v2379_v1 = vsub.f32 %v2214_v63, %v4729_v9  ;;  %v2394_v57 = vmul.f32 %v4674_v17, %v2378_v50  ;;  %v3253_v44 = vpop.eup %3252  ;;  %v2317_v51 = vadd.f32 1.0, %v3245_v8  ;;  %v2319_v13 = vadd.f32 1.0, %v3247_v20 }
 0x319   : > { %v2416_v41 = vadd.f32 %v4668_v43, %v2396_v10  ;;  %v2397_v56 = vmul.f32 %v4700_v29, %v2381_v47  ;;  %v2367_v33 = vmul.f32 %v4646_v28, %v4695_v19  ;;  %3264 = vrcp.f32 %v1644_v62 }
 0x31a   : > { %v2395_v5 = vmul.f32 %v4687_v46, %v2379_v1  ;;  %1712 = vadd.xlane.f32.xlu1 %v4373_v59  ;;  %v2893_v9 = vpop.f32.mrb[40].mxu1  ;;  %v2414_v17 = vadd.f32 %v4668_v43, %v2394_v57  ;;  %3266 = vrcp.f32 %v2319_v13  ;;  %v2370_v20 = vmul.f32 %v4646_v28, %v4655_v4 }
 0x31b   : > { %v2432_v32 = vmul.f32 %v3249_v16, %v2416_v41  ;;  %v2417_v29 = vadd.f32 %v4668_v43, %v2397_v56  ;;  %v2235_v37 = vadd.f32 %v2893_v9, %v4710_v26  ;;  %v2226_v35 = vpop.f32.mrb[41].mxu1  ;;  %v3255_v53 = vpop.eup %3254  ;;  %3268 = vrcp.f32 %v2317_v51 }
 0x31c   : > { %v2415_v24 = vadd.f32 %v4668_v43, %v2395_v5  ;;  %v2227_v46 = vadd.f32 %v2226_v35, %v4710_v26  ;;  %v2894_v21 = vpop.f32.mrb[42].mxu1  ;;  %v2430_v58 = vmul.f32 %v3241_v12, %v2414_v17  ;;  %v3257_v25 = vpop.eup %3256 }
 0x31d   : > { %2448 = vst [vmem:[%s4770_s28 + $0x30] sm:$0xff] %v2432_v32  ;;  %v2433_v11 = vmul.f32 %v3253_v44, %v2417_v29  ;;  %v2384_v31 = vsub.f32 %v2235_v37, %v2368_v27  ;;  %v4801_v38 = vadd.f32 %v2894_v21, %v4710_v26  ;;  %v2229_v52 = vpop.f32.mrb[43].mxu1  ;;  %v3259_v19 = vpop.eup %3258  ;;  %v1747_v21 = vmul.f32 %v4373_v59, %v4373_v59 }
 0x31e   : > { %v2431_v15 = vmul.f32 %v3251_v3, %v2415_v24  ;;  %v2382_v45 = vsub.f32 %v2227_v46, %v2366_v0  ;;  %v2230_v48 = vadd.f32 %v2229_v52, %v4710_v26  ;;  %2446 = vst [vmem:[%s4770_s28 + $0x20] sm:$0xff] %v2430_v58 }
 0x31f   : > { %2449 = vst [vmem:[%s4770_s28 + $0x38] sm:$0xff] %v2433_v11  ;;  %v2400_v54 = vmul.f32 %v4748_v2, %v2384_v31  ;;  %v3261_v47 = vpop.eup %3260  ;;  %v2372_v2 = vmul.f32 %v4646_v28, %v4706_v39 }
 0x320   : > { %2447 = vst [vmem:[%s4770_s28 + $0x28] sm:$0xff] %v2431_v15  ;;  %v2398_v12 = vmul.f32 %v4736_v30, %v2382_v45  ;;  %v2383_v22 = vsub.f32 %v2230_v48, %v2367_v33  ;;  %v2795_v45 = vmul.f32 -1.442695, %v4339_v6 }
 0x321   : > { %v2420_v61 = vadd.f32 %v4668_v43, %v2400_v54  ;;  %v3263_v1 = vpop.eup %3262 }
 0x322   : > { %v2418_v63 = vadd.f32 %v4668_v43, %v2398_v12  ;;  %v2399_v10 = vmul.f32 %v3257_v25, %v2383_v22  ;;  %v2897_v50 = vpop.f32.mrb[44].mxu1 }
 0x323   : > { %v2436_v8 = vmul.f32 %v3259_v19, %v2420_v61  ;;  %v2251_v62 = vadd.f32 %v2897_v50, %v4710_v26  ;;  %v2242_v30 = vpop.f32.mrb[45].mxu1  ;;  %v3265_v17 = vpop.eup %3264 }
 0x324   : > { %v2434_v41 = vmul.f32 %v3261_v47, %v2418_v63  ;;  %v2419_v57 = vadd.f32 %v4668_v43, %v2399_v10  ;;  %v2243_v56 = vadd.f32 %v2242_v30, %v4710_v26  ;;  %v2898_v16 = vpop.f32.mrb[46].mxu1  ;;  %v3267_v37 = vpop.eup %3266  ;;  %v5047_v63 = vld [vmem:[#allocation14_spill] sm:$0xff] }
 0x325   : > { %2452 = vst [vmem:[%s4770_s28 + $0x50] sm:$0xff] %v2436_v8  ;;  %v2388_v0 = vsub.f32 %v2251_v62, %v2372_v2  ;;  %v4822_v27 = vadd.f32 %v2898_v16, %v4710_v26  ;;  %v2245_v39 = vpop.f32.mrb[47].mxu1  ;;  %v3269_v44 = vpop.eup %3268  ;;  %v5048_v62 = vld [vmem:[#allocation8_spill] sm:$0xff] }
 0x326   : > { %2450 = vst [vmem:[%s4770_s28 + $0x40] sm:$0xff] %v2434_v41  ;;  %v2435_v5 = vmul.f32 %v3263_v1, %v2419_v57  ;;  %v2386_v9 = vsub.f32 %v2243_v56, %v2370_v20  ;;  %v4826_v3 = vadd.f32 %v2245_v39, %v4710_v26  ;;  %v2794_v26 = vmul.f32 -1.442695, %v4332_v23  ;;  %v5049_v20 = vld [vmem:[#allocation17_spill] sm:$0xff]  ;;  %v5051_v56 = vld [vmem:[#allocation15_spill] sm:$0xff] }
 0x327   : > { %v2404_v4 = vmul.f32 %v3255_v53, %v2388_v0  ;;  %v2838_v23 = vmul.f32 -1.442695, %v4604_v60  ;;  %v2797_v30 = vmul.f32 -1.442695, %v5048_v62  ;;  %v5050_v41 = vld [vmem:[#allocation9_spill] sm:$0xff]  ;;  %v1749_v0 = vmul.f32 %v5047_v63, %v5047_v63 }
 0x328   : > { %2451 = vst [vmem:[%s4770_s28 + $0x48] sm:$0xff] %v2435_v5  ;;  %v2402_v32 = vmul.f32 %v4775_v14, %v2386_v9  ;;  %3270 = vpow2.f32 %v2794_v26  ;;  %v2799_v57 = vmul.f32 -1.442695, %v5050_v41  ;;  %v2801_v16 = vmul.f32 -1.442695, %v5051_v56 }
 0x329   : > { %v2424_v29 = vadd.f32 %v4668_v43, %v2404_v4 }
 0x32a   : > { %v2422_v35 = vadd.f32 %v4668_v43, %v2402_v32 }
 0x32b   : > { %v2440_v51 = vmul.f32 %v3267_v37, %v2424_v29  ;;  %2493 = vperm.xlu1 %2987, %v3265_v17  }
 0x32c   : > { %v2438_v13 = vmul.f32 %v3269_v44, %v2422_v35  ;;  %v2840_v44 = vmul.f32 -1.442695, %v4652_v49 }
 0x32d   : > { %2456 = vst [vmem:[%s4770_s28 + $0x70] sm:$0xff] %v2440_v51 }
 0x32e   : > { %2454 = vst [vmem:[%s4770_s28 + $0x60] sm:$0xff] %v2438_v13 }
 0x332   : > { %v3271_v58 = vpop.eup %3270 }
 0x333   : > { %v1645_v11 = vadd.f32 1.0, %v3271_v58 }
 0x335   : > { %3272 = vrcp.f32 %v1645_v11 }
 0x336   : > { %3274 = vpow2.f32 %v2838_v23 }
 0x337   : > { %3276 = vpow2.f32 %v2795_v45 }
 0x33d   : > { %v1709_v24 = vpop.xlane.xlu1 %1708 }
 0x33e   : > { %v1729_v52 = vmul.f32 0.0078125, %v1709_v24 }
 0x33f   : > { %v3273_v31 = vpop.eup %3272 }
 0x340   : > { %v1809_v15 = vmul.f32 %v1729_v52, %v1729_v52  ;;  %v3275_v54 = vpop.eup %3274  ;;  %v2369_v22 = vmul.f32 %v4646_v28, %v1729_v52 }
 0x341   : > { %v2484_v46 = vpop.permute.xlu1 %2483  ;;  %v2316_v60 = vadd.f32 1.0, %v3275_v54  ;;  %v3277_v25 = vpop.eup %3276 }
 0x342   : > { %v2545_v14 = vsel %vm2460_vm0, %v2484_v46, %v4522_v55  ;;  %v2385_v6 = vsub.f32 %v4801_v38, %v2369_v22  ;;  %v1646_v10 = vadd.f32 1.0, %v3277_v25 }
 0x343   : > { %2562 = vst.msk [vmem:[%s4490_s22 + $0x20] sm:$0xff] %vm2557_vm1, %v2545_v14 }
 0x34f   : > { %1776 = vadd.xlane.f32.xlu1 %v1747_v21 }
 0x360   : > { %2498 = vperm.xlu1 %2987, %v3273_v31  }
 0x372   : > { %v1773_v33 = vpop.xlane.xlu1 %1772 }
 0x373   : > { %v1793_v55 = vmul.f32 0.0078125, %v1773_v33 }
 0x375   : > { %v1825_v48 = vsub.f32 %v1793_v55, %v1809_v15 }
 0x376   : > { %v2489_v53 = vpop.permute.xlu1 %2488 }
 0x377   : > { %v1841_v59 = vadd.f32 1e-05, %v1825_v48  ;;  %v2546_v12 = vsel %vm2460_vm0, %v2489_v53, %v4527_v34  ;;  %v2842_v53 = vmul.f32 -1.442695, %v4698_v36 }
 0x378   : > { %2563 = vst.msk [vmem:[%s4490_s22 + $0x28] sm:$0xff] %vm2557_vm1, %v2546_v12 }
 0x379   : > { %3278 = vrsqrt.f32 %v1841_v59 }
 0x37a   : > { %3280 = vrcp.f32 %v2316_v60 }
 0x37b   : > { %3282 = vrcp.f32 %v1646_v10 }
 0x37c   : > { %3284 = vpow2.f32 %v2797_v30 }
 0x37d   : > { %3286 = vpow2.f32 %v2799_v57 }
 0x37e   : > { %3288 = vpow2.f32 %v2801_v16 }
 0x383   : > { %v3279_v61 = vpop.eup %3278 }
 0x384   : > { %v2401_v19 = vmul.f32 %v3279_v61, %v2385_v6  ;;  %1716 = vadd.xlane.f32.xlu1 %v5047_v63  ;;  %v3281_v50 = vpop.eup %3280  ;;  %v5052_v63 = vld [vmem:[#allocation16_spill] sm:$0xff] }
 0x385   : > { %v3283_v2 = vpop.eup %3282 }
 0x386   : > { %v2421_v34 = vadd.f32 %v4668_v43, %v2401_v19  ;;  %v3285_v39 = vpop.eup %3284 }
 0x387   : > { %v1648_v5 = vadd.f32 1.0, %v3285_v39  ;;  %v3287_v9 = vpop.eup %3286 }
 0x388   : > { %v2437_v47 = vmul.f32 %v3281_v50, %v2421_v34  ;;  %v1650_v4 = vadd.f32 1.0, %v3287_v9  ;;  %v3289_v32 = vpop.eup %3288 }
 0x389   : > { %3290 = vrcp.f32 %v1648_v5  ;;  %v1652_v17 = vadd.f32 1.0, %v3289_v32 }
 0x38a   : > { %2453 = vst [vmem:[%s4770_s28 + $0x58] sm:$0xff] %v2437_v47  ;;  %3292 = vrcp.f32 %v1650_v4  ;;  %v5053_v47 = vld [vmem:[#allocation10_spill] sm:$0xff] }
 0x38b   : > { %3294 = vrcp.f32 %v1652_v17 }
 0x38c   : > { %3296 = vpow2.f32 %v2840_v44 }
 0x393   : > { %v3291_v29 = vpop.eup %3290 }
 0x394   : > { %v3293_v37 = vpop.eup %3292 }
 0x395   : > { %2503 = vperm.xlu1 %2987, %v3283_v2   ;;  %v3295_v35 = vpop.eup %3294 }
 0x396   : > { %v3297_v14 = vpop.eup %3296 }
 0x397   : > { %v2318_v31 = vadd.f32 1.0, %v3297_v14 }
 0x3a7   : > { %v1713_v8 = vpop.xlane.xlu1 %1712 }
 0x3a8   : > { %v1731_v51 = vmul.f32 0.0078125, %v1713_v8 }
 0x3aa   : > { %v1811_v24 = vmul.f32 %v1731_v51, %v1731_v51  ;;  %v2371_v49 = vmul.f32 %v4646_v28, %v1731_v51 }
 0x3ab   : > { %v2494_v1 = vpop.permute.xlu1 %2493 }
 0x3ac   : > { %v2547_v38 = vsel %vm2460_vm0, %v2494_v1, %v5049_v20  ;;  %v2387_v23 = vsub.f32 %v4826_v3, %v2371_v49 }
 0x3ad   : > { %2564 = vst.msk [vmem:[%s4490_s22 + $0x30] sm:$0xff] %vm2557_vm1, %v2547_v38 }
 0x3b9   : > { %1780 = vadd.xlane.f32.xlu1 %v1749_v0 }
 0x3ca   : > { %2513 = vperm.xlu1 %2987, %v3291_v29  }
 0x3ce   : > { %2523 = vperm.xlu1 %2987, %v3293_v37  }
 0x3d2   : > { %2533 = vperm.xlu1 %2987, %v3295_v35  }
 0x3dc   : > { %v1777_v13 = vpop.xlane.xlu1 %1776 }
 0x3dd   : > { %v1795_v26 = vmul.f32 0.0078125, %v1777_v13 }
 0x3df   : > { %v1827_v46 = vsub.f32 %v1795_v26, %v1811_v24 }
 0x3e0   : > { %v2499_v21 = vpop.permute.xlu1 %2498 }
 0x3e1   : > { %v1843_v58 = vadd.f32 1e-05, %v1827_v46  ;;  %v2548_v11 = vsel %vm2460_vm0, %v2499_v21, %v4547_v42 }
 0x3e2   : > { %2565 = vst.msk [vmem:[%s4490_s22 + $0x38] sm:$0xff] %vm2557_vm1, %v2548_v11 }
 0x3e3   : > { %3298 = vrsqrt.f32 %v1843_v58 }
 0x3e4   : > { %3300 = vrcp.f32 %v2318_v31 }
 0x3e5   : > { %3302 = vpow2.f32 %v2842_v53 }
 0x3ed   : > { %v3299_v52 = vpop.eup %3298 }
 0x3ee   : > { %v2403_v33 = vmul.f32 %v3299_v52, %v2387_v23  ;;  %v3301_v55 = vpop.eup %3300 }
 0x3ef   : > { %v3303_v25 = vpop.eup %3302 }
 0x3f0   : > { %v2423_v15 = vadd.f32 %v4668_v43, %v2403_v33  ;;  %v2320_v36 = vadd.f32 1.0, %v3303_v25 }
 0x3f2   : > { %v2439_v45 = vmul.f32 %v3301_v55, %v2423_v15 }
 0x3f4   : > { %2455 = vst [vmem:[%s4770_s28 + $0x68] sm:$0xff] %v2439_v45 }
 0x411   : > { %v1717_v48 = vpop.xlane.xlu1 %1716 }
 0x412   : > { %v1733_v3 = vmul.f32 0.0078125, %v1717_v48 }
 0x414   : > { %v1813_v12 = vmul.f32 %v1733_v3, %v1733_v3  ;;  %v2373_v34 = vmul.f32 %v4646_v28, %v1733_v3 }
 0x415   : > { %v2504_v42 = vpop.permute.xlu1 %2503 }
 0x416   : > { %v2549_v54 = vsel %vm2460_vm0, %v2504_v42, %v4572_v18  ;;  %v2389_v2 = vsub.f32 %v4822_v27, %v2373_v34 }
 0x417   : > { %2566 = vst.msk [vmem:[%s4490_s22 + $0x40] sm:$0xff] %vm2557_vm1, %v2549_v54 }
 0x446   : > { %v1781_v59 = vpop.xlane.xlu1 %1780 }
 0x447   : > { %v1797_v60 = vmul.f32 0.0078125, %v1781_v59 }
 0x449   : > { %v1829_v22 = vsub.f32 %v1797_v60, %v1813_v12 }
 0x44a   : > { %v2514_v6 = vpop.permute.xlu1 %2513 }
 0x44b   : > { %v1845_v61 = vadd.f32 1e-05, %v1829_v22  ;;  %v2551_v18 = vsel %vm2460_vm0, %v2514_v6, %v4600_v40 }
 0x44c   : > { %2568 = vst.msk [vmem:[%s4490_s22 + $0x50] sm:$0xff] %vm2557_vm1, %v2551_v18 }
 0x44d   : > { %3304 = vrsqrt.f32 %v1845_v61 }
 0x44e   : > { %v2524_v19 = vpop.permute.xlu1 %2523  ;;  %3306 = vrcp.f32 %v2320_v36 }
 0x44f   : > { %v2553_v10 = vsel %vm2460_vm0, %v2524_v19, %v5052_v63 }
 0x450   : > { %2570 = vst.msk [vmem:[%s4490_s22 + $0x60] sm:$0xff] %vm2557_vm1, %v2553_v10 }
 0x452   : > { %v2534_v50 = vpop.permute.xlu1 %2533 }
 0x453   : > { %v2555_v40 = vsel %vm2460_vm0, %v2534_v50, %v5053_v47 }
 0x454   : > { %2572 = vst.msk [vmem:[%s4490_s22 + $0x70] sm:$0xff] %vm2557_vm1, %v2555_v40  ;;  %s3408_s22 = smov [#allocation5]  }
 0x455   : > { %s3340_s27 = sshll.u32 %s3408_s22, 4  ;;  %s3341_s27 = int_to_ptr.vmem [resolvable:$false] %s3340_s27 }
 0x456   : > { %s3342_s25 = scalar_lea.vmem %s3341_s27, 4096  ;;  %p3343_p2 = scmp.lt.s32.totalorder %s4905_s29, %s3341_s27 }
 0x457   : > { %v3305_v8 = vpop.eup %3304  ;;  %p3344_p3 = scmp.lt.s32.totalorder %s3342_s25, %s3336_s13 }
 0x458   : > { %v2405_v62 = vmul.f32 %v3305_v8, %v2389_v2  ;;  %v3307_v1 = vpop.eup %3306 }
 0x459   : > { %p3345_p4 = por %p3344_p3, %p3343_p2 }
 0x45a   : > { %v2425_v30 = vadd.f32 %v4668_v43, %v2405_v62 }
 0x45b   : > { %p3346_p7 = pnand %p3345_p4, %p3339_p12 }
 0x45c   : > { %v2441_v7 = vmul.f32 %v3307_v1, %v2425_v30 }
 0x45e   : > { %2457 = vst [vmem:[%s4770_s28 + $0x78] sm:$0xff] %v2441_v7 }
 0x45f   : > { %3349 = shalt.err (!%p3346_p7)
}
 0x460   : > { %s3350_s17 = scalar_lea.hbm %s4903_s21, 2048  ;;  %s3354_s24 = scalar_lea.hbm %s4959_s8, 4096 }
 0x461   : > { %p3351_p8 = scmp.ne.s32.totalorder %s4903_s21, %s3350_s17  ;;  %p3355_p1 = scmp.lt.u32.totalorder %s4903_s21, %s4959_s8 }
 0x462   : > { %p3356_p0 = scmp.lt.u32.totalorder %s3354_s24, %s3350_s17  ;;  %p3358_p6 = scmp.lt.u32.totalorder %s3350_s17, %s4903_s21 }
 0x463   : > { %p3352_p11 = pnand %p3351_p8, %p5054_p9 }
 0x464   : > { %p3357_p5 = por %p3356_p0, %p3355_p1 }
 0x465   : > { %p3353_p13 = pneg %p3352_p11 }
 0x466   : > { %p3359_p10 = por %p3358_p6, %p3357_p5 }
 0x468   : > { %p3360_p12 = pnand %p3359_p10, %p3353_p13 }
 0x46a   : > { %3363 = shalt.err (!%p3360_p12)
}
 0x46b   : > { %s3409_s13 = smov 128   ;;  %s3410_s22 = smov 8  }
 0x46c   : > { %2935 = dma.vmem_to_hbm [thread:$0]  (%p5054_p9), %s4905_s29, 2048, %s4903_s21, %s4910_s16, %s3409_s13, %s3409_s13, %s3410_s22  }
 0x46d PF: > { %p2947_p2 = scmp.ge.s32.totalorder %s3402_s12, 2  ;;  %s2612_s27 = sand.u32 1, %s3390_s30  }
 0x46e   : > { %p5055_p3 = scmp.ne.s32.totalorder %s4987_s20, 0  ;;  %s2613_s25 = scalar_lea.sflag [#allocation4], %s2612_s27 }
 0x470   : > { %p2942_p4 = pnand %p2947_p2, %p5055_p3 }
 0x472   : > { %3385 = dma.done.wait (!%p2942_p4), %s2613_s25, 2048  }
 0x473   : > { %3387 = vsyncadd (!%p2942_p4), %s2613_s25, 4294965248  ;;  %p21_p7 = scmp.ge.s32.totalorder %s3486_s15, 4   ;;  %s5056_s30 = smov %s3394_s10 }
 0x474   : > { %s5057_s10 = smov %s3398_s11  ;;  %s5058_s11 = smov %s3497_s18 }
 0x475   : > { %s5059_s12 = smov %s3486_s15  ;;  %23 = sbr.rel (!%p21_p7) target bundleno = 4 (0x4), region = 107 }
 0x47c   :  { %2626 = vsyncpa [#allocation3], 1 }
 0x47d   :  { %2628 = vsyncpa [#allocation3 + $0x1], 1 }
 0x47e   :  { %2629 = vsyncpa [#allocation4], 1 }
 0x47f   :  { %2631 = vsyncpa [#allocation4 + $0x1], 1 }

</bundles_post_ra>
